<compile_context>
chip_gen: v7x
topology: tpu7x:2x2x1
jax: 0.10.0
libtpu: 0.0.40
codegen_flags: <defaults>
</compile_context>

<pallas_src>
import functools
import math

import jax
import jax.numpy as jnp
from jax.experimental import pallas as pl
from jax.experimental.pallas import tpu as pltpu


_MXU_DTYPE = jnp.bfloat16   # MXU operand dtype / inter-layer activation dtype
_LN_EPS = 1e-12             # matches the reference custom LayerNorm
_VMEM_LIMIT = 32 * 1024 * 1024


def _pick_tile(m):
    for t in (512, 256, 128):
        if m % t == 0:
            return t
    return m


# ----------------------------------------------------------------------------
# In-kernel building blocks
# ----------------------------------------------------------------------------
def _layernorm(y, gamma, beta, eps):
    # biased variance, f32 statistics (matches the reference LayerNorm)
    mean = jnp.mean(y, axis=-1, keepdims=True)
    var = jnp.mean((y - mean) ** 2, axis=-1, keepdims=True)
    return gamma * ((y - mean) * jax.lax.rsqrt(var + eps)) + beta


def _mha_heads(xq, xkv, mask_f32, wq, wk, wv, bq, bk, bv, wo_h, n_head, scale):
    """Head-batched multi-head attention, heads merged through Wo.

    xq:[Sq,D] bf16, xkv:[Sk,D] bf16, mask_f32:[Sq,Sk] (0/1),
    wq/wk/wv:[H,D,dh] bf16, bq/bk/bv:[H,1,dh] f32, wo_h:[H,dh,D] bf16.
    Returns [Sq, D] f32 (already projected through Wo, no lane concat).
    """
    H = n_head
    Sq, D = xq.shape
    Sk = xkv.shape[0]

    q3 = jnp.broadcast_to(xq.astype(_MXU_DTYPE)[None], (H, Sq, D))
    kv3 = jnp.broadcast_to(xkv.astype(_MXU_DTYPE)[None], (H, Sk, D))

    q = jnp.einsum('hsd,hde->hse', q3, wq, preferred_element_type=jnp.float32) + bq
    k = jnp.einsum('hsd,hde->hse', kv3, wk, preferred_element_type=jnp.float32) + bk
    v = jnp.einsum('hsd,hde->hse', kv3, wv, preferred_element_type=jnp.float32) + bv

    s = jnp.einsum('hqe,hke->hqk', q.astype(_MXU_DTYPE), k.astype(_MXU_DTYPE),
                   preferred_element_type=jnp.float32) * scale
    neg = jnp.broadcast_to((mask_f32 == 0.0)[None], s.shape)
    s = jnp.where(neg, jnp.float32(-10000.0), s)          # masked_fill(-10000)

    s = s - jnp.max(s, axis=-1, keepdims=True)             # f32 softmax
    p = jnp.exp(s)
    p = p * pl.reciprocal(jnp.sum(p, axis=-1, keepdims=True), approx=True)

    ctx = jnp.einsum('hqk,hke->hqe', p.astype(_MXU_DTYPE), v.astype(_MXU_DTYPE),
                     preferred_element_type=jnp.float32)    # [H,Sq,dh]

    # merge heads via the per-head output-projection slabs: sum_h ctx_h @ Wo_h
    yh = jnp.einsum('hqe,hed->hqd', ctx.astype(_MXU_DTYPE), wo_h,
                    preferred_element_type=jnp.float32)     # [H,Sq,D]
    return jnp.sum(yh, axis=0)                              # [Sq,D]


# ----------------------------------------------------------------------------
# Fused decoder-layer kernel (whole layer in one pallas_call)
# ----------------------------------------------------------------------------
def _decoder_layer_kernel(dec_ref, enc_ref, tmask_ref, smask_ref,
                          wqkv_ref, bqkv_ref, wo1_ref, bo1_ref, g1_ref, be1_ref,
                          wq2_ref, bq2_ref, wkv2_ref, bkv2_ref, wo2_ref,
                          bo2_ref, g2_ref, be2_ref,
                          w1_ref, b1_ref, w2_ref, b2_ref, g3_ref, be3_ref,
                          o_ref, *, n_head, scale, eps):
    x_in = dec_ref[0]                                   # [Sq, D] bf16
    enc = enc_ref[0]                                    # [Sk, D] bf16
    tmask = tmask_ref[0].astype(jnp.float32)            # [Sq, Sq]
    smask = smask_ref[0].astype(jnp.float32)            # [Sq, Sk]

    x = x_in.astype(jnp.float32)                        # residual stream, f32

    # ---- self-attention + out-proj + residual + LayerNorm -------------------
    attn = _mha_heads(x_in, x_in, tmask,
                      wqkv_ref[0], wqkv_ref[1], wqkv_ref[2],
                      bqkv_ref[0], bqkv_ref[1], bqkv_ref[2],
                      wo1_ref[...], n_head, scale)
    x = _layernorm(attn + bo1_ref[...] + x, g1_ref[...], be1_ref[...], eps)

    # ---- encoder-decoder attention + residual + LayerNorm -------------------
    attn = _mha_heads(x.astype(_MXU_DTYPE), enc, smask,
                      wq2_ref[...], wkv2_ref[0], wkv2_ref[1],
                      bq2_ref[...], bkv2_ref[0], bkv2_ref[1],
                      wo2_ref[...], n_head, scale)
    x = _layernorm(attn + bo2_ref[...] + x, g2_ref[...], be2_ref[...], eps)

    # ---- position-wise FFN + residual + LayerNorm (hidden never leaves VMEM)
    h = jnp.dot(x.astype(_MXU_DTYPE), w1_ref[...],
                preferred_element_type=jnp.float32) + b1_ref[...]
    h = jnp.maximum(h, 0.0)
    y = jnp.dot(h.astype(_MXU_DTYPE), w2_ref[...],
                preferred_element_type=jnp.float32) + b2_ref[...]
    x = _layernorm(y + x, g3_ref[...], be3_ref[...], eps)

    o_ref[0] = x.astype(o_ref.dtype)


def decoder_layer(dec, enc, tmask, smask, p, n_head):
    """dec:[B,Sq,D] bf16, enc:[B,Sk,D] bf16, masks int8 -> [B,Sq,D] bf16."""
    B, Sq, D = dec.shape
    Sk = enc.shape[1]
    H = n_head
    dh = D // H
    Hf = p["ffn_w1"].shape[1]
    scale = 1.0 / math.sqrt(dh)

    def full(shape):
        return pl.BlockSpec(shape, lambda b, _s=shape: (0,) * len(_s))

    kern = functools.partial(_decoder_layer_kernel,
                             n_head=H, scale=scale, eps=_LN_EPS)
    return pl.pallas_call(
        kern,
        grid=(B,),
        in_specs=[
            pl.BlockSpec((1, Sq, D), lambda b: (b, 0, 0)),
            pl.BlockSpec((1, Sk, D), lambda b: (b, 0, 0)),
            pl.BlockSpec((1, Sq, Sq), lambda b: (b, 0, 0)),
            pl.BlockSpec((1, Sq, Sk), lambda b: (b, 0, 0)),
            full((3, H, D, dh)), full((3, H, 1, dh)),      # fused Wq|Wk|Wv, biases
            full((H, dh, D)), full((1, D)), full((1, D)), full((1, D)),
            full((H, D, dh)), full((H, 1, dh)),            # cross-attn Wq
            full((2, H, D, dh)), full((2, H, 1, dh)),      # fused Wk|Wv (cross)
            full((H, dh, D)), full((1, D)), full((1, D)), full((1, D)),
            full((D, Hf)), full((1, Hf)), full((Hf, D)), full((1, D)),
            full((1, D)), full((1, D)),
        ],
        out_specs=pl.BlockSpec((1, Sq, D), lambda b: (b, 0, 0)),
        out_shape=jax.ShapeDtypeStruct((B, Sq, D), _MXU_DTYPE),
        compiler_params=pltpu.CompilerParams(
            dimension_semantics=("parallel",),
            vmem_limit_bytes=_VMEM_LIMIT),
    )(dec, enc, tmask, smask,
      p["w_qkv_h"], p["b_qkv_h"], p["wo_h"], p["bo"], p["g1"], p["be1"],
      p["wq2_h"], p["bq2_h"], p["w_kv2_h"], p["b_kv2_h"], p["wo2_h"],
      p["bo2"], p["g2"], p["be2"],
      p["ffn_w1"], p["ffn_b1"], p["ffn_w2"], p["ffn_b2"], p["g3"], p["be3"])


# ----------------------------------------------------------------------------
# Final vocab projection
# ----------------------------------------------------------------------------
def _linear_kernel(x_ref, w_ref, b_ref, o_ref):
    y = jnp.dot(x_ref[...].astype(_MXU_DTYPE), w_ref[...],
                preferred_element_type=jnp.float32)
    o_ref[...] = (y + b_ref[...]).astype(o_ref.dtype)


def linear(x, w, b):
    """x:[M,K] @ w:[K,N] + b:[1,N] -> f32 logits, tiled over (M, N)."""
    M, K = x.shape
    N = w.shape[1]
    tm, tn = _pick_tile(M), _pick_tile(N)
    return pl.pallas_call(
        _linear_kernel,
        grid=(M // tm, N // tn),
        in_specs=[
            pl.BlockSpec((tm, K), lambda i, j: (i, 0)),
            pl.BlockSpec((K, tn), lambda i, j: (0, j)),
            pl.BlockSpec((1, tn), lambda i, j: (0, j)),
        ],
        out_specs=pl.BlockSpec((tm, tn), lambda i, j: (i, j)),
        out_shape=jax.ShapeDtypeStruct((M, N), jnp.float32),
        compiler_params=pltpu.CompilerParams(
            dimension_semantics=("parallel", "parallel"),
            vmem_limit_bytes=_VMEM_LIMIT),
    )(x, w, b)


# ----------------------------------------------------------------------------
# Model glue
# ----------------------------------------------------------------------------
def sinusoidal_encoding(max_len, d_model):
    pos = jnp.arange(max_len, dtype=jnp.float32)[:, None]
    i2 = jnp.arange(0, d_model, 2, dtype=jnp.float32)
    angles = pos / jnp.power(10000.0, i2 / d_model)
    enc = jnp.zeros((max_len, d_model), jnp.float32)
    enc = enc.at[:, 0::2].set(jnp.sin(angles))
    enc = enc.at[:, 1::2].set(jnp.cos(angles))
    return enc


def decoder_forward(trg_ids, enc_out, trg_mask, src_mask, params, n_head):
    B, S = trg_ids.shape
    # TransformerEmbedding: token gather + positional encoding (+ dropout = id)
    x = params["tok_emb"][trg_ids] + params["pos_enc"][:S][None, :, :]
    x = x.astype(_MXU_DTYPE)                     # bf16 residual stream to HBM
    enc = enc_out.astype(_MXU_DTYPE)
    tmask = (trg_mask[:, 0] != 0).astype(jnp.int8)   # [B, Sq, Sq] int8
    smask = (src_mask[:, 0] != 0).astype(jnp.int8)   # [B, Sq, Sk] int8
    for lp in params["layers"]:
        x = decoder_layer(x, enc, tmask, smask, lp, n_head)
    D = x.shape[-1]
    logits = linear(x.reshape(B * S, D), params["out_w"], params["out_b"])
    return logits.reshape(B, S, -1)


# ----------------------------------------------------------------------------
# Deterministic parameter init (head-major bf16 matmul weights, f32 biases/LN)
# ----------------------------------------------------------------------------
def init_decoder_params(key, vocab, max_len, d_model, ffn_hidden, n_head, n_layers):
    dh = d_model // n_head
    keys = iter(jax.random.split(key, 128))

    def w(*shape):
        return (jax.random.normal(next(keys), shape, jnp.float32) * 0.02
                ).astype(_MXU_DTYPE)

    tok_emb = jax.random.normal(next(keys), (vocab, d_model), jnp.float32) * 0.02
    tok_emb = tok_emb.at[1].set(0.0)             # nn.Embedding(padding_idx=1)
    pos_enc = sinusoidal_encoding(max_len, d_model)

    layers = []
    for _ in range(n_layers):
        layers.append(dict(
            w_qkv_h=w(3, n_head, d_model, dh),                 # fused Wq|Wk|Wv
            b_qkv_h=jnp.zeros((3, n_head, 1, dh), jnp.float32),
            wo_h=w(n_head, dh, d_model),
            bo=jnp.zeros((1, d_model), jnp.float32),
            g1=jnp.ones((1, d_model), jnp.float32),
            be1=jnp.zeros((1, d_model), jnp.float32),
            wq2_h=w(n_head, d_model, dh),
            bq2_h=jnp.zeros((n_head, 1, dh), jnp.float32),
            w_kv2_h=w(2, n_head, d_model, dh),                 # fused Wk|Wv (cross)
            b_kv2_h=jnp.zeros((2, n_head, 1, dh), jnp.float32),
            wo2_h=w(n_head, dh, d_model),
            bo2=jnp.zeros((1, d_model), jnp.float32),
            g2=jnp.ones((1, d_model), jnp.float32),
            be2=jnp.zeros((1, d_model), jnp.float32),
            ffn_w1=w(d_model, ffn_hidden),
            ffn_b1=jnp.zeros((1, ffn_hidden), jnp.float32),
            ffn_w2=w(ffn_hidden, d_model),
            ffn_b2=jnp.zeros((1, d_model), jnp.float32),
            g3=jnp.ones((1, d_model), jnp.float32),
            be3=jnp.zeros((1, d_model), jnp.float32),
        ))

    out_w = w(d_model, vocab)
    out_b = jnp.zeros((1, vocab), jnp.float32)
    return dict(tok_emb=tok_emb, pos_enc=pos_enc, layers=layers,
                out_w=out_w, out_b=out_b)


# ----------------------------------------------------------------------------
if __name__ == "__main__":
    # small hyper-params consistent with the module
    dec_voc_size = 32
    max_len = 16
    d_model = 32
    ffn_hidden = 64
    n_head = 4
    n_layers = 2

    B, S_trg, S_src = 2, 8, 8

    key = jax.random.PRNGKey(0)
    k_par, k_ids, k_enc = jax.random.split(key, 3)

    params = init_decoder_params(k_par, dec_voc_size, max_len, d_model,
                                 ffn_hidden, n_head, n_layers)

    trg_ids = jax.random.randint(k_ids, (B, S_trg), 0, dec_voc_size, jnp.int32)
    enc_out = jax.random.normal(k_enc, (B, S_src, d_model), jnp.float32)

    # trg_mask: causal [B,1,St,St]; src_mask: pad mask broadcast to [B,1,St,Ss]
    causal = jnp.tril(jnp.ones((S_trg, S_trg), jnp.float32))
    trg_mask = jnp.broadcast_to(causal[None, None], (B, 1, S_trg, S_trg))
    src_mask = jnp.ones((B, 1, S_trg, S_src), jnp.float32)
    src_mask = src_mask.at[0, :, :, -1].set(0.0)  # mask last src token of batch 0

    out = decoder_forward(trg_ids, enc_out, trg_mask, src_mask, params, n_head)
    out = jax.block_until_ready(out)

    assert out.shape == (B, S_trg, dec_voc_size)
    assert bool(jnp.all(jnp.isfinite(out)))
    print("KERNEL_OK")
</pallas_src>

<mosaic_0001>
module attributes {stable_mosaic.version = 11 : i64} {
  func.func @_decoder_layer_kernel(%arg0: i32, %arg1: memref<1x8x32xbf16, #tpu.memory_space<vmem>>, %arg2: memref<1x8x32xbf16, #tpu.memory_space<vmem>>, %arg3: memref<1x8x8xi8, #tpu.memory_space<vmem>>, %arg4: memref<1x8x8xi8, #tpu.memory_space<vmem>>, %arg5: memref<3x4x32x8xbf16, #tpu.memory_space<vmem>>, %arg6: memref<3x4x1x8xf32, #tpu.memory_space<vmem>>, %arg7: memref<4x8x32xbf16, #tpu.memory_space<vmem>>, %arg8: memref<1x32xf32, #tpu.memory_space<vmem>>, %arg9: memref<1x32xf32, #tpu.memory_space<vmem>>, %arg10: memref<1x32xf32, #tpu.memory_space<vmem>>, %arg11: memref<4x32x8xbf16, #tpu.memory_space<vmem>>, %arg12: memref<4x1x8xf32, #tpu.memory_space<vmem>>, %arg13: memref<2x4x32x8xbf16, #tpu.memory_space<vmem>>, %arg14: memref<2x4x1x8xf32, #tpu.memory_space<vmem>>, %arg15: memref<4x8x32xbf16, #tpu.memory_space<vmem>>, %arg16: memref<1x32xf32, #tpu.memory_space<vmem>>, %arg17: memref<1x32xf32, #tpu.memory_space<vmem>>, %arg18: memref<1x32xf32, #tpu.memory_space<vmem>>, %arg19: memref<32x64xbf16, #tpu.memory_space<vmem>>, %arg20: memref<1x64xf32, #tpu.memory_space<vmem>>, %arg21: memref<64x32xbf16, #tpu.memory_space<vmem>>, %arg22: memref<1x32xf32, #tpu.memory_space<vmem>>, %arg23: memref<1x32xf32, #tpu.memory_space<vmem>>, %arg24: memref<1x32xf32, #tpu.memory_space<vmem>>, %arg25: memref<1x8x32xbf16, #tpu.memory_space<vmem>>) attributes {dimension_semantics = [#tpu.dimension_semantics<parallel>], iteration_bounds = array<i64: 2>, scalar_prefetch = 0 : i64, scratch_operands = 0 : i64, tpu.core_type = #tpu.core_type<tc>, window_params = [{transform_indices = @transform_0, window_bounds = array<i64: 1, 8, 32>}, {transform_indices = @transform_1, window_bounds = array<i64: 1, 8, 32>}, {transform_indices = @transform_2, window_bounds = array<i64: 1, 8, 8>}, {transform_indices = @transform_3, window_bounds = array<i64: 1, 8, 8>}, {pipeline_mode = #tpu.pipeline_mode<synchronous>, transform_indices = @transform_4, window_bounds = array<i64: 3, 4, 32, 8>}, {pipeline_mode = #tpu.pipeline_mode<synchronous>, transform_indices = @transform_5, window_bounds = array<i64: 3, 4, 1, 8>}, {pipeline_mode = #tpu.pipeline_mode<synchronous>, transform_indices = @transform_6, window_bounds = array<i64: 4, 8, 32>}, {pipeline_mode = #tpu.pipeline_mode<synchronous>, transform_indices = @transform_7, window_bounds = array<i64: 1, 32>}, {pipeline_mode = #tpu.pipeline_mode<synchronous>, transform_indices = @transform_8, window_bounds = array<i64: 1, 32>}, {pipeline_mode = #tpu.pipeline_mode<synchronous>, transform_indices = @transform_9, window_bounds = array<i64: 1, 32>}, {pipeline_mode = #tpu.pipeline_mode<synchronous>, transform_indices = @transform_10, window_bounds = array<i64: 4, 32, 8>}, {pipeline_mode = #tpu.pipeline_mode<synchronous>, transform_indices = @transform_11, window_bounds = array<i64: 4, 1, 8>}, {pipeline_mode = #tpu.pipeline_mode<synchronous>, transform_indices = @transform_12, window_bounds = array<i64: 2, 4, 32, 8>}, {pipeline_mode = #tpu.pipeline_mode<synchronous>, transform_indices = @transform_13, window_bounds = array<i64: 2, 4, 1, 8>}, {pipeline_mode = #tpu.pipeline_mode<synchronous>, transform_indices = @transform_14, window_bounds = array<i64: 4, 8, 32>}, {pipeline_mode = #tpu.pipeline_mode<synchronous>, transform_indices = @transform_15, window_bounds = array<i64: 1, 32>}, {pipeline_mode = #tpu.pipeline_mode<synchronous>, transform_indices = @transform_16, window_bounds = array<i64: 1, 32>}, {pipeline_mode = #tpu.pipeline_mode<synchronous>, transform_indices = @transform_17, window_bounds = array<i64: 1, 32>}, {pipeline_mode = #tpu.pipeline_mode<synchronous>, transform_indices = @transform_18, window_bounds = array<i64: 32, 64>}, {pipeline_mode = #tpu.pipeline_mode<synchronous>, transform_indices = @transform_19, window_bounds = array<i64: 1, 64>}, {pipeline_mode = #tpu.pipeline_mode<synchronous>, transform_indices = @transform_20, window_bounds = array<i64: 64, 32>}, {pipeline_mode = #tpu.pipeline_mode<synchronous>, transform_indices = @transform_21, window_bounds = array<i64: 1, 32>}, {pipeline_mode = #tpu.pipeline_mode<synchronous>, transform_indices = @transform_22, window_bounds = array<i64: 1, 32>}, {pipeline_mode = #tpu.pipeline_mode<synchronous>, transform_indices = @transform_23, window_bounds = array<i64: 1, 32>}, {transform_indices = @transform_24, window_bounds = array<i64: 1, 8, 32>}]} {
    %c0 = arith.constant 0 : index
    %c0_0 = arith.constant 0 : index
    %c0_1 = arith.constant 0 : index
    %0 = vector.load %arg1[%c0, %c0_0, %c0_1] : memref<1x8x32xbf16, #tpu.memory_space<vmem>>, vector<1x8x32xbf16>
    %1 = vector.shape_cast %0 : vector<1x8x32xbf16> to vector<8x32xbf16>
    %c0_2 = arith.constant 0 : index
    %c0_3 = arith.constant 0 : index
    %c0_4 = arith.constant 0 : index
    %2 = vector.load %arg2[%c0_2, %c0_3, %c0_4] : memref<1x8x32xbf16, #tpu.memory_space<vmem>>, vector<1x8x32xbf16>
    %3 = vector.shape_cast %2 : vector<1x8x32xbf16> to vector<8x32xbf16>
    %c0_5 = arith.constant 0 : index
    %c0_6 = arith.constant 0 : index
    %c0_7 = arith.constant 0 : index
    %4 = vector.load %arg3[%c0_5, %c0_6, %c0_7] : memref<1x8x8xi8, #tpu.memory_space<vmem>>, vector<1x8x8xi8>
    %5 = vector.shape_cast %4 : vector<1x8x8xi8> to vector<8x8xi8>
    %6 = arith.sitofp %5 : vector<8x8xi8> to vector<8x8xf32>
    %c0_8 = arith.constant 0 : index
    %c0_9 = arith.constant 0 : index
    %c0_10 = arith.constant 0 : index
    %7 = vector.load %arg4[%c0_8, %c0_9, %c0_10] : memref<1x8x8xi8, #tpu.memory_space<vmem>>, vector<1x8x8xi8>
    %8 = vector.shape_cast %7 : vector<1x8x8xi8> to vector<8x8xi8>
    %9 = arith.sitofp %8 : vector<8x8xi8> to vector<8x8xf32>
    %10 = arith.extf %1 : vector<8x32xbf16> to vector<8x32xf32>
    %c0_11 = arith.constant 0 : index
    %c0_12 = arith.constant 0 : index
    %c0_13 = arith.constant 0 : index
    %c0_14 = arith.constant 0 : index
    %11 = vector.load %arg5[%c0_11, %c0_12, %c0_13, %c0_14] : memref<3x4x32x8xbf16, #tpu.memory_space<vmem>>, vector<1x4x32x8xbf16>
    %12 = vector.shape_cast %11 : vector<1x4x32x8xbf16> to vector<4x32x8xbf16>
    %c1 = arith.constant 1 : index
    %c0_15 = arith.constant 0 : index
    %c0_16 = arith.constant 0 : index
    %c0_17 = arith.constant 0 : index
    %13 = vector.load %arg5[%c1, %c0_15, %c0_16, %c0_17] : memref<3x4x32x8xbf16, #tpu.memory_space<vmem>>, vector<1x4x32x8xbf16>
    %14 = vector.shape_cast %13 : vector<1x4x32x8xbf16> to vector<4x32x8xbf16>
    %c2 = arith.constant 2 : index
    %c0_18 = arith.constant 0 : index
    %c0_19 = arith.constant 0 : index
    %c0_20 = arith.constant 0 : index
    %15 = vector.load %arg5[%c2, %c0_18, %c0_19, %c0_20] : memref<3x4x32x8xbf16, #tpu.memory_space<vmem>>, vector<1x4x32x8xbf16>
    %16 = vector.shape_cast %15 : vector<1x4x32x8xbf16> to vector<4x32x8xbf16>
    %c0_21 = arith.constant 0 : index
    %c0_22 = arith.constant 0 : index
    %c0_23 = arith.constant 0 : index
    %c0_24 = arith.constant 0 : index
    %17 = vector.load %arg6[%c0_21, %c0_22, %c0_23, %c0_24] : memref<3x4x1x8xf32, #tpu.memory_space<vmem>>, vector<1x4x1x8xf32>
    %18 = vector.shape_cast %17 : vector<1x4x1x8xf32> to vector<4x1x8xf32>
    %c1_25 = arith.constant 1 : index
    %c0_26 = arith.constant 0 : index
    %c0_27 = arith.constant 0 : index
    %c0_28 = arith.constant 0 : index
    %19 = vector.load %arg6[%c1_25, %c0_26, %c0_27, %c0_28] : memref<3x4x1x8xf32, #tpu.memory_space<vmem>>, vector<1x4x1x8xf32>
    %20 = vector.shape_cast %19 : vector<1x4x1x8xf32> to vector<4x1x8xf32>
    %c2_29 = arith.constant 2 : index
    %c0_30 = arith.constant 0 : index
    %c0_31 = arith.constant 0 : index
    %c0_32 = arith.constant 0 : index
    %21 = vector.load %arg6[%c2_29, %c0_30, %c0_31, %c0_32] : memref<3x4x1x8xf32, #tpu.memory_space<vmem>>, vector<1x4x1x8xf32>
    %22 = vector.shape_cast %21 : vector<1x4x1x8xf32> to vector<4x1x8xf32>
    %c0_33 = arith.constant 0 : index
    %c0_34 = arith.constant 0 : index
    %c0_35 = arith.constant 0 : index
    %23 = vector.load %arg7[%c0_33, %c0_34, %c0_35] : memref<4x8x32xbf16, #tpu.memory_space<vmem>>, vector<4x8x32xbf16>
    %24 = vector.shape_cast %1 : vector<8x32xbf16> to vector<1x8x32xbf16>
    %25 = vector.shape_cast %24 : vector<1x8x32xbf16> to vector<1x8x32xbf16>
    %26 = vector.broadcast %25 : vector<1x8x32xbf16> to vector<4x8x32xbf16>
    %27 = vector.shape_cast %1 : vector<8x32xbf16> to vector<1x8x32xbf16>
    %28 = vector.shape_cast %27 : vector<1x8x32xbf16> to vector<1x8x32xbf16>
    %29 = vector.broadcast %28 : vector<1x8x32xbf16> to vector<4x8x32xbf16>
    "tpu.trace_start"() <{level = 10 : i32, message = "hsd,hde->hse"}> : () -> ()
    %cst = arith.constant dense<0.000000e+00> : vector<4x8x8xf32>
    %30 = tpu.matmul %26, %12, %cst {dimension_numbers = #tpu.dot_dimension_numbers<[2], [1], [1], [2], [0, 0, 0, 1, 1, 2], [0], [0]>} : vector<4x8x32xbf16>, vector<4x32x8xbf16>, vector<4x8x8xf32> -> vector<4x8x8xf32>
    "tpu.trace_stop"() : () -> ()
    %31 = vector.broadcast %18 : vector<4x1x8xf32> to vector<4x8x8xf32>
    %32 = arith.addf %30, %31 : vector<4x8x8xf32>
    "tpu.trace_start"() <{level = 10 : i32, message = "hsd,hde->hse"}> : () -> ()
    %cst_36 = arith.constant dense<0.000000e+00> : vector<4x8x8xf32>
    %33 = tpu.matmul %29, %14, %cst_36 {dimension_numbers = #tpu.dot_dimension_numbers<[2], [1], [1], [2], [0, 0, 0, 1, 1, 2], [0], [0]>} : vector<4x8x32xbf16>, vector<4x32x8xbf16>, vector<4x8x8xf32> -> vector<4x8x8xf32>
    "tpu.trace_stop"() : () -> ()
    %34 = vector.broadcast %20 : vector<4x1x8xf32> to vector<4x8x8xf32>
    %35 = arith.addf %33, %34 : vector<4x8x8xf32>
    "tpu.trace_start"() <{level = 10 : i32, message = "hsd,hde->hse"}> : () -> ()
    %cst_37 = arith.constant dense<0.000000e+00> : vector<4x8x8xf32>
    %36 = tpu.matmul %29, %16, %cst_37 {dimension_numbers = #tpu.dot_dimension_numbers<[2], [1], [1], [2], [0, 0, 0, 1, 1, 2], [0], [0]>} : vector<4x8x32xbf16>, vector<4x32x8xbf16>, vector<4x8x8xf32> -> vector<4x8x8xf32>
    "tpu.trace_stop"() : () -> ()
    %37 = vector.broadcast %22 : vector<4x1x8xf32> to vector<4x8x8xf32>
    %38 = arith.addf %36, %37 : vector<4x8x8xf32>
    %39 = arith.truncf %32 : vector<4x8x8xf32> to vector<4x8x8xbf16>
    %40 = arith.truncf %35 : vector<4x8x8xf32> to vector<4x8x8xbf16>
    "tpu.trace_start"() <{level = 10 : i32, message = "hqe,hke->hqk"}> : () -> ()
    %cst_38 = arith.constant dense<0.000000e+00> : vector<4x8x8xf32>
    %41 = tpu.matmul %39, %40, %cst_38 {dimension_numbers = #tpu.dot_dimension_numbers<[2], [2], [1], [1], [0, 0, 0, 1, 1, 1], [0], [0]>} : vector<4x8x8xbf16>, vector<4x8x8xbf16>, vector<4x8x8xf32> -> vector<4x8x8xf32>
    "tpu.trace_stop"() : () -> ()
    %cst_39 = arith.constant 0.353553385 : f32
    %42 = vector.broadcast %cst_39 : f32 to vector<4x8x8xf32>
    %43 = arith.mulf %41, %42 : vector<4x8x8xf32>
    %cst_40 = arith.constant 0.000000e+00 : f32
    %44 = vector.broadcast %cst_40 : f32 to vector<8x8xf32>
    %45 = arith.cmpf oeq, %6, %44 : vector<8x8xf32>
    %46 = vector.shape_cast %45 : vector<8x8xi1> to vector<1x8x8xi1>
    %47 = vector.shape_cast %46 : vector<1x8x8xi1> to vector<1x8x8xi1>
    %48 = vector.broadcast %47 : vector<1x8x8xi1> to vector<4x8x8xi1>
    %cst_41 = arith.constant -1.000000e+04 : f32
    %49 = vector.broadcast %cst_41 : f32 to vector<4x8x8xf32>
    %50 = arith.select %48, %49, %43 : vector<4x8x8xi1>, vector<4x8x8xf32>
    %cst_42 = arith.constant dense<0xFF800000> : vector<4x8xf32>
    %51 = vector.multi_reduction <maximumf>, %50, %cst_42 [2] : vector<4x8x8xf32> to vector<4x8xf32>
    %52 = vector.shape_cast %51 : vector<4x8xf32> to vector<4x8x1xf32>
    %53 = vector.broadcast %52 : vector<4x8x1xf32> to vector<4x8x8xf32>
    %54 = arith.subf %50, %53 : vector<4x8x8xf32>
    %55 = math.exp %54 : vector<4x8x8xf32>
    %cst_43 = arith.constant dense<0.000000e+00> : vector<4x8xf32>
    %56 = vector.multi_reduction <add>, %55, %cst_43 [2] : vector<4x8x8xf32> to vector<4x8xf32>
    %57 = vector.shape_cast %56 : vector<4x8xf32> to vector<4x8x1xf32>
    %58 = tpu.reciprocal %57 {approx = true} : vector<4x8x1xf32> -> vector<4x8x1xf32>
    %59 = vector.broadcast %58 : vector<4x8x1xf32> to vector<4x8x8xf32>
    %60 = arith.mulf %55, %59 : vector<4x8x8xf32>
    %61 = arith.truncf %60 : vector<4x8x8xf32> to vector<4x8x8xbf16>
    %62 = arith.truncf %38 : vector<4x8x8xf32> to vector<4x8x8xbf16>
    "tpu.trace_start"() <{level = 10 : i32, message = "hqk,hke->hqe"}> : () -> ()
    %cst_44 = arith.constant dense<0.000000e+00> : vector<4x8x8xf32>
    %63 = tpu.matmul %61, %62, %cst_44 {dimension_numbers = #tpu.dot_dimension_numbers<[2], [1], [1], [2], [0, 0, 0, 1, 1, 2], [0], [0]>} : vector<4x8x8xbf16>, vector<4x8x8xbf16>, vector<4x8x8xf32> -> vector<4x8x8xf32>
    "tpu.trace_stop"() : () -> ()
    %64 = arith.truncf %63 : vector<4x8x8xf32> to vector<4x8x8xbf16>
    "tpu.trace_start"() <{level = 10 : i32, message = "hqe,hed->hqd"}> : () -> ()
    %cst_45 = arith.constant dense<0.000000e+00> : vector<4x8x32xf32>
    %65 = tpu.matmul %64, %23, %cst_45 {dimension_numbers = #tpu.dot_dimension_numbers<[2], [1], [1], [2], [0, 0, 0, 1, 1, 2], [0], [0]>} : vector<4x8x8xbf16>, vector<4x8x32xbf16>, vector<4x8x32xf32> -> vector<4x8x32xf32>
    "tpu.trace_stop"() : () -> ()
    %cst_46 = arith.constant dense<0.000000e+00> : vector<8x32xf32>
    %66 = vector.multi_reduction <add>, %65, %cst_46 [0] : vector<4x8x32xf32> to vector<8x32xf32>
    %c0_47 = arith.constant 0 : index
    %c0_48 = arith.constant 0 : index
    %67 = vector.load %arg8[%c0_47, %c0_48] : memref<1x32xf32, #tpu.memory_space<vmem>>, vector<1x32xf32>
    %68 = vector.broadcast %67 : vector<1x32xf32> to vector<8x32xf32>
    %69 = arith.addf %66, %68 : vector<8x32xf32>
    %70 = arith.addf %69, %10 : vector<8x32xf32>
    %c0_49 = arith.constant 0 : index
    %c0_50 = arith.constant 0 : index
    %71 = vector.load %arg9[%c0_49, %c0_50] : memref<1x32xf32, #tpu.memory_space<vmem>>, vector<1x32xf32>
    %c0_51 = arith.constant 0 : index
    %c0_52 = arith.constant 0 : index
    %72 = vector.load %arg10[%c0_51, %c0_52] : memref<1x32xf32, #tpu.memory_space<vmem>>, vector<1x32xf32>
    %cst_53 = arith.constant dense<0.000000e+00> : vector<8xf32>
    %73 = vector.multi_reduction <add>, %70, %cst_53 [1] : vector<8x32xf32> to vector<8xf32>
    %74 = vector.shape_cast %73 : vector<8xf32> to vector<8x1xf32>
    %cst_54 = arith.constant 3.200000e+01 : f32
    %75 = vector.broadcast %cst_54 : f32 to vector<8x1xf32>
    %76 = arith.divf %74, %75 : vector<8x1xf32>
    %77 = vector.broadcast %76 : vector<8x1xf32> to vector<8x32xf32>
    %78 = arith.subf %70, %77 : vector<8x32xf32>
    %79 = arith.mulf %78, %78 : vector<8x32xf32>
    %cst_55 = arith.constant dense<0.000000e+00> : vector<8xf32>
    %80 = vector.multi_reduction <add>, %79, %cst_55 [1] : vector<8x32xf32> to vector<8xf32>
    %81 = vector.shape_cast %80 : vector<8xf32> to vector<8x1xf32>
    %cst_56 = arith.constant 3.200000e+01 : f32
    %82 = vector.broadcast %cst_56 : f32 to vector<8x1xf32>
    %83 = arith.divf %81, %82 : vector<8x1xf32>
    %84 = vector.broadcast %76 : vector<8x1xf32> to vector<8x32xf32>
    %85 = arith.subf %70, %84 : vector<8x32xf32>
    %cst_57 = arith.constant 9.99999996E-13 : f32
    %86 = vector.broadcast %cst_57 : f32 to vector<8x1xf32>
    %87 = arith.addf %83, %86 : vector<8x1xf32>
    %88 = math.rsqrt %87 : vector<8x1xf32>
    %89 = vector.broadcast %88 : vector<8x1xf32> to vector<8x32xf32>
    %90 = arith.mulf %85, %89 : vector<8x32xf32>
    %91 = vector.broadcast %71 : vector<1x32xf32> to vector<8x32xf32>
    %92 = arith.mulf %91, %90 : vector<8x32xf32>
    %93 = vector.broadcast %72 : vector<1x32xf32> to vector<8x32xf32>
    %94 = arith.addf %92, %93 : vector<8x32xf32>
    %95 = arith.truncf %94 : vector<8x32xf32> to vector<8x32xbf16>
    %c0_58 = arith.constant 0 : index
    %c0_59 = arith.constant 0 : index
    %c0_60 = arith.constant 0 : index
    %96 = vector.load %arg11[%c0_58, %c0_59, %c0_60] : memref<4x32x8xbf16, #tpu.memory_space<vmem>>, vector<4x32x8xbf16>
    %c0_61 = arith.constant 0 : index
    %c0_62 = arith.constant 0 : index
    %c0_63 = arith.constant 0 : index
    %c0_64 = arith.constant 0 : index
    %97 = vector.load %arg13[%c0_61, %c0_62, %c0_63, %c0_64] : memref<2x4x32x8xbf16, #tpu.memory_space<vmem>>, vector<1x4x32x8xbf16>
    %98 = vector.shape_cast %97 : vector<1x4x32x8xbf16> to vector<4x32x8xbf16>
    %c1_65 = arith.constant 1 : index
    %c0_66 = arith.constant 0 : index
    %c0_67 = arith.constant 0 : index
    %c0_68 = arith.constant 0 : index
    %99 = vector.load %arg13[%c1_65, %c0_66, %c0_67, %c0_68] : memref<2x4x32x8xbf16, #tpu.memory_space<vmem>>, vector<1x4x32x8xbf16>
    %100 = vector.shape_cast %99 : vector<1x4x32x8xbf16> to vector<4x32x8xbf16>
    %c0_69 = arith.constant 0 : index
    %c0_70 = arith.constant 0 : index
    %c0_71 = arith.constant 0 : index
    %101 = vector.load %arg12[%c0_69, %c0_70, %c0_71] : memref<4x1x8xf32, #tpu.memory_space<vmem>>, vector<4x1x8xf32>
    %c0_72 = arith.constant 0 : index
    %c0_73 = arith.constant 0 : index
    %c0_74 = arith.constant 0 : index
    %c0_75 = arith.constant 0 : index
    %102 = vector.load %arg14[%c0_72, %c0_73, %c0_74, %c0_75] : memref<2x4x1x8xf32, #tpu.memory_space<vmem>>, vector<1x4x1x8xf32>
    %103 = vector.shape_cast %102 : vector<1x4x1x8xf32> to vector<4x1x8xf32>
    %c1_76 = arith.constant 1 : index
    %c0_77 = arith.constant 0 : index
    %c0_78 = arith.constant 0 : index
    %c0_79 = arith.constant 0 : index
    %104 = vector.load %arg14[%c1_76, %c0_77, %c0_78, %c0_79] : memref<2x4x1x8xf32, #tpu.memory_space<vmem>>, vector<1x4x1x8xf32>
    %105 = vector.shape_cast %104 : vector<1x4x1x8xf32> to vector<4x1x8xf32>
    %c0_80 = arith.constant 0 : index
    %c0_81 = arith.constant 0 : index
    %c0_82 = arith.constant 0 : index
    %106 = vector.load %arg15[%c0_80, %c0_81, %c0_82] : memref<4x8x32xbf16, #tpu.memory_space<vmem>>, vector<4x8x32xbf16>
    %107 = vector.shape_cast %95 : vector<8x32xbf16> to vector<1x8x32xbf16>
    %108 = vector.shape_cast %107 : vector<1x8x32xbf16> to vector<1x8x32xbf16>
    %109 = vector.broadcast %108 : vector<1x8x32xbf16> to vector<4x8x32xbf16>
    %110 = vector.shape_cast %3 : vector<8x32xbf16> to vector<1x8x32xbf16>
    %111 = vector.shape_cast %110 : vector<1x8x32xbf16> to vector<1x8x32xbf16>
    %112 = vector.broadcast %111 : vector<1x8x32xbf16> to vector<4x8x32xbf16>
    "tpu.trace_start"() <{level = 10 : i32, message = "hsd,hde->hse"}> : () -> ()
    %cst_83 = arith.constant dense<0.000000e+00> : vector<4x8x8xf32>
    %113 = tpu.matmul %109, %96, %cst_83 {dimension_numbers = #tpu.dot_dimension_numbers<[2], [1], [1], [2], [0, 0, 0, 1, 1, 2], [0], [0]>} : vector<4x8x32xbf16>, vector<4x32x8xbf16>, vector<4x8x8xf32> -> vector<4x8x8xf32>
    "tpu.trace_stop"() : () -> ()
    %114 = vector.broadcast %101 : vector<4x1x8xf32> to vector<4x8x8xf32>
    %115 = arith.addf %113, %114 : vector<4x8x8xf32>
    "tpu.trace_start"() <{level = 10 : i32, message = "hsd,hde->hse"}> : () -> ()
    %cst_84 = arith.constant dense<0.000000e+00> : vector<4x8x8xf32>
    %116 = tpu.matmul %112, %98, %cst_84 {dimension_numbers = #tpu.dot_dimension_numbers<[2], [1], [1], [2], [0, 0, 0, 1, 1, 2], [0], [0]>} : vector<4x8x32xbf16>, vector<4x32x8xbf16>, vector<4x8x8xf32> -> vector<4x8x8xf32>
    "tpu.trace_stop"() : () -> ()
    %117 = vector.broadcast %103 : vector<4x1x8xf32> to vector<4x8x8xf32>
    %118 = arith.addf %116, %117 : vector<4x8x8xf32>
    "tpu.trace_start"() <{level = 10 : i32, message = "hsd,hde->hse"}> : () -> ()
    %cst_85 = arith.constant dense<0.000000e+00> : vector<4x8x8xf32>
    %119 = tpu.matmul %112, %100, %cst_85 {dimension_numbers = #tpu.dot_dimension_numbers<[2], [1], [1], [2], [0, 0, 0, 1, 1, 2], [0], [0]>} : vector<4x8x32xbf16>, vector<4x32x8xbf16>, vector<4x8x8xf32> -> vector<4x8x8xf32>
    "tpu.trace_stop"() : () -> ()
    %120 = vector.broadcast %105 : vector<4x1x8xf32> to vector<4x8x8xf32>
    %121 = arith.addf %119, %120 : vector<4x8x8xf32>
    %122 = arith.truncf %115 : vector<4x8x8xf32> to vector<4x8x8xbf16>
    %123 = arith.truncf %118 : vector<4x8x8xf32> to vector<4x8x8xbf16>
    "tpu.trace_start"() <{level = 10 : i32, message = "hqe,hke->hqk"}> : () -> ()
    %cst_86 = arith.constant dense<0.000000e+00> : vector<4x8x8xf32>
    %124 = tpu.matmul %122, %123, %cst_86 {dimension_numbers = #tpu.dot_dimension_numbers<[2], [2], [1], [1], [0, 0, 0, 1, 1, 1], [0], [0]>} : vector<4x8x8xbf16>, vector<4x8x8xbf16>, vector<4x8x8xf32> -> vector<4x8x8xf32>
    "tpu.trace_stop"() : () -> ()
    %cst_87 = arith.constant 0.353553385 : f32
    %125 = vector.broadcast %cst_87 : f32 to vector<4x8x8xf32>
    %126 = arith.mulf %124, %125 : vector<4x8x8xf32>
    %cst_88 = arith.constant 0.000000e+00 : f32
    %127 = vector.broadcast %cst_88 : f32 to vector<8x8xf32>
    %128 = arith.cmpf oeq, %9, %127 : vector<8x8xf32>
    %129 = vector.shape_cast %128 : vector<8x8xi1> to vector<1x8x8xi1>
    %130 = vector.shape_cast %129 : vector<1x8x8xi1> to vector<1x8x8xi1>
    %131 = vector.broadcast %130 : vector<1x8x8xi1> to vector<4x8x8xi1>
    %cst_89 = arith.constant -1.000000e+04 : f32
    %132 = vector.broadcast %cst_89 : f32 to vector<4x8x8xf32>
    %133 = arith.select %131, %132, %126 : vector<4x8x8xi1>, vector<4x8x8xf32>
    %cst_90 = arith.constant dense<0xFF800000> : vector<4x8xf32>
    %134 = vector.multi_reduction <maximumf>, %133, %cst_90 [2] : vector<4x8x8xf32> to vector<4x8xf32>
    %135 = vector.shape_cast %134 : vector<4x8xf32> to vector<4x8x1xf32>
    %136 = vector.broadcast %135 : vector<4x8x1xf32> to vector<4x8x8xf32>
    %137 = arith.subf %133, %136 : vector<4x8x8xf32>
    %138 = math.exp %137 : vector<4x8x8xf32>
    %cst_91 = arith.constant dense<0.000000e+00> : vector<4x8xf32>
    %139 = vector.multi_reduction <add>, %138, %cst_91 [2] : vector<4x8x8xf32> to vector<4x8xf32>
    %140 = vector.shape_cast %139 : vector<4x8xf32> to vector<4x8x1xf32>
    %141 = tpu.reciprocal %140 {approx = true} : vector<4x8x1xf32> -> vector<4x8x1xf32>
    %142 = vector.broadcast %141 : vector<4x8x1xf32> to vector<4x8x8xf32>
    %143 = arith.mulf %138, %142 : vector<4x8x8xf32>
    %144 = arith.truncf %143 : vector<4x8x8xf32> to vector<4x8x8xbf16>
    %145 = arith.truncf %121 : vector<4x8x8xf32> to vector<4x8x8xbf16>
    "tpu.trace_start"() <{level = 10 : i32, message = "hqk,hke->hqe"}> : () -> ()
    %cst_92 = arith.constant dense<0.000000e+00> : vector<4x8x8xf32>
    %146 = tpu.matmul %144, %145, %cst_92 {dimension_numbers = #tpu.dot_dimension_numbers<[2], [1], [1], [2], [0, 0, 0, 1, 1, 2], [0], [0]>} : vector<4x8x8xbf16>, vector<4x8x8xbf16>, vector<4x8x8xf32> -> vector<4x8x8xf32>
    "tpu.trace_stop"() : () -> ()
    %147 = arith.truncf %146 : vector<4x8x8xf32> to vector<4x8x8xbf16>
    "tpu.trace_start"() <{level = 10 : i32, message = "hqe,hed->hqd"}> : () -> ()
    %cst_93 = arith.constant dense<0.000000e+00> : vector<4x8x32xf32>
    %148 = tpu.matmul %147, %106, %cst_93 {dimension_numbers = #tpu.dot_dimension_numbers<[2], [1], [1], [2], [0, 0, 0, 1, 1, 2], [0], [0]>} : vector<4x8x8xbf16>, vector<4x8x32xbf16>, vector<4x8x32xf32> -> vector<4x8x32xf32>
    "tpu.trace_stop"() : () -> ()
    %cst_94 = arith.constant dense<0.000000e+00> : vector<8x32xf32>
    %149 = vector.multi_reduction <add>, %148, %cst_94 [0] : vector<4x8x32xf32> to vector<8x32xf32>
    %c0_95 = arith.constant 0 : index
    %c0_96 = arith.constant 0 : index
    %150 = vector.load %arg16[%c0_95, %c0_96] : memref<1x32xf32, #tpu.memory_space<vmem>>, vector<1x32xf32>
    %151 = vector.broadcast %150 : vector<1x32xf32> to vector<8x32xf32>
    %152 = arith.addf %149, %151 : vector<8x32xf32>
    %153 = arith.addf %152, %94 : vector<8x32xf32>
    %c0_97 = arith.constant 0 : index
    %c0_98 = arith.constant 0 : index
    %154 = vector.load %arg17[%c0_97, %c0_98] : memref<1x32xf32, #tpu.memory_space<vmem>>, vector<1x32xf32>
    %c0_99 = arith.constant 0 : index
    %c0_100 = arith.constant 0 : index
    %155 = vector.load %arg18[%c0_99, %c0_100] : memref<1x32xf32, #tpu.memory_space<vmem>>, vector<1x32xf32>
    %cst_101 = arith.constant dense<0.000000e+00> : vector<8xf32>
    %156 = vector.multi_reduction <add>, %153, %cst_101 [1] : vector<8x32xf32> to vector<8xf32>
    %157 = vector.shape_cast %156 : vector<8xf32> to vector<8x1xf32>
    %cst_102 = arith.constant 3.200000e+01 : f32
    %158 = vector.broadcast %cst_102 : f32 to vector<8x1xf32>
    %159 = arith.divf %157, %158 : vector<8x1xf32>
    %160 = vector.broadcast %159 : vector<8x1xf32> to vector<8x32xf32>
    %161 = arith.subf %153, %160 : vector<8x32xf32>
    %162 = arith.mulf %161, %161 : vector<8x32xf32>
    %cst_103 = arith.constant dense<0.000000e+00> : vector<8xf32>
    %163 = vector.multi_reduction <add>, %162, %cst_103 [1] : vector<8x32xf32> to vector<8xf32>
    %164 = vector.shape_cast %163 : vector<8xf32> to vector<8x1xf32>
    %cst_104 = arith.constant 3.200000e+01 : f32
    %165 = vector.broadcast %cst_104 : f32 to vector<8x1xf32>
    %166 = arith.divf %164, %165 : vector<8x1xf32>
    %167 = vector.broadcast %159 : vector<8x1xf32> to vector<8x32xf32>
    %168 = arith.subf %153, %167 : vector<8x32xf32>
    %cst_105 = arith.constant 9.99999996E-13 : f32
    %169 = vector.broadcast %cst_105 : f32 to vector<8x1xf32>
    %170 = arith.addf %166, %169 : vector<8x1xf32>
    %171 = math.rsqrt %170 : vector<8x1xf32>
    %172 = vector.broadcast %171 : vector<8x1xf32> to vector<8x32xf32>
    %173 = arith.mulf %168, %172 : vector<8x32xf32>
    %174 = vector.broadcast %154 : vector<1x32xf32> to vector<8x32xf32>
    %175 = arith.mulf %174, %173 : vector<8x32xf32>
    %176 = vector.broadcast %155 : vector<1x32xf32> to vector<8x32xf32>
    %177 = arith.addf %175, %176 : vector<8x32xf32>
    %178 = arith.truncf %177 : vector<8x32xf32> to vector<8x32xbf16>
    %c0_106 = arith.constant 0 : index
    %c0_107 = arith.constant 0 : index
    %179 = vector.load %arg19[%c0_106, %c0_107] : memref<32x64xbf16, #tpu.memory_space<vmem>>, vector<32x64xbf16>
    %cst_108 = arith.constant dense<0.000000e+00> : vector<8x64xf32>
    %180 = tpu.matmul %178, %179, %cst_108 {dimension_numbers = #tpu.dot_dimension_numbers<[1], [0], [0], [1], [0, 0, 1, 1], [], []>} : vector<8x32xbf16>, vector<32x64xbf16>, vector<8x64xf32> -> vector<8x64xf32>
    %c0_109 = arith.constant 0 : index
    %c0_110 = arith.constant 0 : index
    %181 = vector.load %arg20[%c0_109, %c0_110] : memref<1x64xf32, #tpu.memory_space<vmem>>, vector<1x64xf32>
    %182 = vector.broadcast %181 : vector<1x64xf32> to vector<8x64xf32>
    %183 = arith.addf %180, %182 : vector<8x64xf32>
    %cst_111 = arith.constant 0.000000e+00 : f32
    %184 = vector.broadcast %cst_111 : f32 to vector<8x64xf32>
    %185 = arith.maximumf %183, %184 : vector<8x64xf32>
    %186 = arith.truncf %185 : vector<8x64xf32> to vector<8x64xbf16>
    %c0_112 = arith.constant 0 : index
    %c0_113 = arith.constant 0 : index
    %187 = vector.load %arg21[%c0_112, %c0_113] : memref<64x32xbf16, #tpu.memory_space<vmem>>, vector<64x32xbf16>
    %cst_114 = arith.constant dense<0.000000e+00> : vector<8x32xf32>
    %188 = tpu.matmul %186, %187, %cst_114 {dimension_numbers = #tpu.dot_dimension_numbers<[1], [0], [0], [1], [0, 0, 1, 1], [], []>} : vector<8x64xbf16>, vector<64x32xbf16>, vector<8x32xf32> -> vector<8x32xf32>
    %c0_115 = arith.constant 0 : index
    %c0_116 = arith.constant 0 : index
    %189 = vector.load %arg22[%c0_115, %c0_116] : memref<1x32xf32, #tpu.memory_space<vmem>>, vector<1x32xf32>
    %190 = vector.broadcast %189 : vector<1x32xf32> to vector<8x32xf32>
    %191 = arith.addf %188, %190 : vector<8x32xf32>
    %192 = arith.addf %191, %177 : vector<8x32xf32>
    %c0_117 = arith.constant 0 : index
    %c0_118 = arith.constant 0 : index
    %193 = vector.load %arg23[%c0_117, %c0_118] : memref<1x32xf32, #tpu.memory_space<vmem>>, vector<1x32xf32>
    %c0_119 = arith.constant 0 : index
    %c0_120 = arith.constant 0 : index
    %194 = vector.load %arg24[%c0_119, %c0_120] : memref<1x32xf32, #tpu.memory_space<vmem>>, vector<1x32xf32>
    %cst_121 = arith.constant dense<0.000000e+00> : vector<8xf32>
    %195 = vector.multi_reduction <add>, %192, %cst_121 [1] : vector<8x32xf32> to vector<8xf32>
    %196 = vector.shape_cast %195 : vector<8xf32> to vector<8x1xf32>
    %cst_122 = arith.constant 3.200000e+01 : f32
    %197 = vector.broadcast %cst_122 : f32 to vector<8x1xf32>
    %198 = arith.divf %196, %197 : vector<8x1xf32>
    %199 = vector.broadcast %198 : vector<8x1xf32> to vector<8x32xf32>
    %200 = arith.subf %192, %199 : vector<8x32xf32>
    %201 = arith.mulf %200, %200 : vector<8x32xf32>
    %cst_123 = arith.constant dense<0.000000e+00> : vector<8xf32>
    %202 = vector.multi_reduction <add>, %201, %cst_123 [1] : vector<8x32xf32> to vector<8xf32>
    %203 = vector.shape_cast %202 : vector<8xf32> to vector<8x1xf32>
    %cst_124 = arith.constant 3.200000e+01 : f32
    %204 = vector.broadcast %cst_124 : f32 to vector<8x1xf32>
    %205 = arith.divf %203, %204 : vector<8x1xf32>
    %206 = vector.broadcast %198 : vector<8x1xf32> to vector<8x32xf32>
    %207 = arith.subf %192, %206 : vector<8x32xf32>
    %cst_125 = arith.constant 9.99999996E-13 : f32
    %208 = vector.broadcast %cst_125 : f32 to vector<8x1xf32>
    %209 = arith.addf %205, %208 : vector<8x1xf32>
    %210 = math.rsqrt %209 : vector<8x1xf32>
    %211 = vector.broadcast %210 : vector<8x1xf32> to vector<8x32xf32>
    %212 = arith.mulf %207, %211 : vector<8x32xf32>
    %213 = vector.broadcast %193 : vector<1x32xf32> to vector<8x32xf32>
    %214 = arith.mulf %213, %212 : vector<8x32xf32>
    %215 = vector.broadcast %194 : vector<1x32xf32> to vector<8x32xf32>
    %216 = arith.addf %214, %215 : vector<8x32xf32>
    %217 = arith.truncf %216 : vector<8x32xf32> to vector<8x32xbf16>
    %c0_126 = arith.constant 0 : index
    %c0_127 = arith.constant 0 : index
    %c0_128 = arith.constant 0 : index
    %218 = vector.load %arg25[%c0_126, %c0_127, %c0_128] : memref<1x8x32xbf16, #tpu.memory_space<vmem>>, vector<1x8x32xbf16>
    %219 = vector.shape_cast %218 : vector<1x8x32xbf16> to vector<8x32xbf16>
    %220 = vector.shape_cast %217 : vector<8x32xbf16> to vector<1x8x32xbf16>
    tpu.vector_store %arg25[%c0_126, %c0_127, %c0_128], %220 {strides = array<i32>} : memref<1x8x32xbf16, #tpu.memory_space<vmem>>, vector<1x8x32xbf16>,
    return
  }
  func.func @transform_0(%arg0: i32) -> (i32, i32, i32) {
    %c0_i32 = arith.constant 0 : i32
    %c0_i32_0 = arith.constant 0 : i32
    %c0_i32_1 = arith.constant 0 : i32
    return %arg0, %c0_i32, %c0_i32_0 : i32, i32, i32
  }
  func.func @transform_1(%arg0: i32) -> (i32, i32, i32) {
    %c0_i32 = arith.constant 0 : i32
    %c0_i32_0 = arith.constant 0 : i32
    %c0_i32_1 = arith.constant 0 : i32
    return %arg0, %c0_i32, %c0_i32_0 : i32, i32, i32
  }
  func.func @transform_2(%arg0: i32) -> (i32, i32, i32) {
    %c0_i32 = arith.constant 0 : i32
    %c0_i32_0 = arith.constant 0 : i32
    %c0_i32_1 = arith.constant 0 : i32
    return %arg0, %c0_i32, %c0_i32_0 : i32, i32, i32
  }
  func.func @transform_3(%arg0: i32) -> (i32, i32, i32) {
    %c0_i32 = arith.constant 0 : i32
    %c0_i32_0 = arith.constant 0 : i32
    %c0_i32_1 = arith.constant 0 : i32
    return %arg0, %c0_i32, %c0_i32_0 : i32, i32, i32
  }
  func.func @transform_4(%arg0: i32) -> (i32, i32, i32, i32) {
    %c0_i32 = arith.constant 0 : i32
    %c0_i32_0 = arith.constant 0 : i32
    %c0_i32_1 = arith.constant 0 : i32
    %c0_i32_2 = arith.constant 0 : i32
    %c0_i32_3 = arith.constant 0 : i32
    return %c0_i32, %c0_i32_0, %c0_i32_1, %c0_i32_2 : i32, i32, i32, i32
  }
  func.func @transform_5(%arg0: i32) -> (i32, i32, i32, i32) {
    %c0_i32 = arith.constant 0 : i32
    %c0_i32_0 = arith.constant 0 : i32
    %c0_i32_1 = arith.constant 0 : i32
    %c0_i32_2 = arith.constant 0 : i32
    %c0_i32_3 = arith.constant 0 : i32
    return %c0_i32, %c0_i32_0, %c0_i32_1, %c0_i32_2 : i32, i32, i32, i32
  }
  func.func @transform_6(%arg0: i32) -> (i32, i32, i32) {
    %c0_i32 = arith.constant 0 : i32
    %c0_i32_0 = arith.constant 0 : i32
    %c0_i32_1 = arith.constant 0 : i32
    %c0_i32_2 = arith.constant 0 : i32
    return %c0_i32, %c0_i32_0, %c0_i32_1 : i32, i32, i32
  }
  func.func @transform_7(%arg0: i32) -> (i32, i32) {
    %c0_i32 = arith.constant 0 : i32
    %c0_i32_0 = arith.constant 0 : i32
    %c0_i32_1 = arith.constant 0 : i32
    return %c0_i32, %c0_i32_0 : i32, i32
  }
  func.func @transform_8(%arg0: i32) -> (i32, i32) {
    %c0_i32 = arith.constant 0 : i32
    %c0_i32_0 = arith.constant 0 : i32
    %c0_i32_1 = arith.constant 0 : i32
    return %c0_i32, %c0_i32_0 : i32, i32
  }
  func.func @transform_9(%arg0: i32) -> (i32, i32) {
    %c0_i32 = arith.constant 0 : i32
    %c0_i32_0 = arith.constant 0 : i32
    %c0_i32_1 = arith.constant 0 : i32
    return %c0_i32, %c0_i32_0 : i32, i32
  }
  func.func @transform_10(%arg0: i32) -> (i32, i32, i32) {
    %c0_i32 = arith.constant 0 : i32
    %c0_i32_0 = arith.constant 0 : i32
    %c0_i32_1 = arith.constant 0 : i32
    %c0_i32_2 = arith.constant 0 : i32
    return %c0_i32, %c0_i32_0, %c0_i32_1 : i32, i32, i32
  }
  func.func @transform_11(%arg0: i32) -> (i32, i32, i32) {
    %c0_i32 = arith.constant 0 : i32
    %c0_i32_0 = arith.constant 0 : i32
    %c0_i32_1 = arith.constant 0 : i32
    %c0_i32_2 = arith.constant 0 : i32
    return %c0_i32, %c0_i32_0, %c0_i32_1 : i32, i32, i32
  }
  func.func @transform_12(%arg0: i32) -> (i32, i32, i32, i32) {
    %c0_i32 = arith.constant 0 : i32
    %c0_i32_0 = arith.constant 0 : i32
    %c0_i32_1 = arith.constant 0 : i32
    %c0_i32_2 = arith.constant 0 : i32
    %c0_i32_3 = arith.constant 0 : i32
    return %c0_i32, %c0_i32_0, %c0_i32_1, %c0_i32_2 : i32, i32, i32, i32
  }
  func.func @transform_13(%arg0: i32) -> (i32, i32, i32, i32) {
    %c0_i32 = arith.constant 0 : i32
    %c0_i32_0 = arith.constant 0 : i32
    %c0_i32_1 = arith.constant 0 : i32
    %c0_i32_2 = arith.constant 0 : i32
    %c0_i32_3 = arith.constant 0 : i32
    return %c0_i32, %c0_i32_0, %c0_i32_1, %c0_i32_2 : i32, i32, i32, i32
  }
  func.func @transform_14(%arg0: i32) -> (i32, i32, i32) {
    %c0_i32 = arith.constant 0 : i32
    %c0_i32_0 = arith.constant 0 : i32
    %c0_i32_1 = arith.constant 0 : i32
    %c0_i32_2 = arith.constant 0 : i32
    return %c0_i32, %c0_i32_0, %c0_i32_1 : i32, i32, i32
  }
  func.func @transform_15(%arg0: i32) -> (i32, i32) {
    %c0_i32 = arith.constant 0 : i32
    %c0_i32_0 = arith.constant 0 : i32
    %c0_i32_1 = arith.constant 0 : i32
    return %c0_i32, %c0_i32_0 : i32, i32
  }
  func.func @transform_16(%arg0: i32) -> (i32, i32) {
    %c0_i32 = arith.constant 0 : i32
    %c0_i32_0 = arith.constant 0 : i32
    %c0_i32_1 = arith.constant 0 : i32
    return %c0_i32, %c0_i32_0 : i32, i32
  }
  func.func @transform_17(%arg0: i32) -> (i32, i32) {
    %c0_i32 = arith.constant 0 : i32
    %c0_i32_0 = arith.constant 0 : i32
    %c0_i32_1 = arith.constant 0 : i32
    return %c0_i32, %c0_i32_0 : i32, i32
  }
  func.func @transform_18(%arg0: i32) -> (i32, i32) {
    %c0_i32 = arith.constant 0 : i32
    %c0_i32_0 = arith.constant 0 : i32
    %c0_i32_1 = arith.constant 0 : i32
    return %c0_i32, %c0_i32_0 : i32, i32
  }
  func.func @transform_19(%arg0: i32) -> (i32, i32) {
    %c0_i32 = arith.constant 0 : i32
    %c0_i32_0 = arith.constant 0 : i32
    %c0_i32_1 = arith.constant 0 : i32
    return %c0_i32, %c0_i32_0 : i32, i32
  }
  func.func @transform_20(%arg0: i32) -> (i32, i32) {
    %c0_i32 = arith.constant 0 : i32
    %c0_i32_0 = arith.constant 0 : i32
    %c0_i32_1 = arith.constant 0 : i32
    return %c0_i32, %c0_i32_0 : i32, i32
  }
  func.func @transform_21(%arg0: i32) -> (i32, i32) {
    %c0_i32 = arith.constant 0 : i32
    %c0_i32_0 = arith.constant 0 : i32
    %c0_i32_1 = arith.constant 0 : i32
    return %c0_i32, %c0_i32_0 : i32, i32
  }
  func.func @transform_22(%arg0: i32) -> (i32, i32) {
    %c0_i32 = arith.constant 0 : i32
    %c0_i32_0 = arith.constant 0 : i32
    %c0_i32_1 = arith.constant 0 : i32
    return %c0_i32, %c0_i32_0 : i32, i32
  }
  func.func @transform_23(%arg0: i32) -> (i32, i32) {
    %c0_i32 = arith.constant 0 : i32
    %c0_i32_0 = arith.constant 0 : i32
    %c0_i32_1 = arith.constant 0 : i32
    return %c0_i32, %c0_i32_0 : i32, i32
  }
  func.func @transform_24(%arg0: i32) -> (i32, i32, i32) {
    %c0_i32 = arith.constant 0 : i32
    %c0_i32_0 = arith.constant 0 : i32
    %c0_i32_1 = arith.constant 0 : i32
    return %arg0, %c0_i32, %c0_i32_0 : i32, i32, i32
  }
}

</mosaic_0001>

<bundles_post_ra>
// kernel: tpu_custom_call.1
= control target key start
LH: loop header
LB: loop body
LE: loop exit
PB: predicated region body
PF: predicated region fallthrough
CT: control target
= control target key end

     0   :  { %s5722_s0 = inlined_call_operand.vmem [shape: bf16[2,8,32], index: 0, kind: input, shape index: {}]   ;;  %s5723_s1 = inlined_call_operand.vmem [shape: bf16[2,8,32], index: 1, kind: input, shape index: {}]   ;;  %s5724_s2 = inlined_call_operand.vmem [shape: s8[2,8,8], index: 2, kind: input, shape index: {}]   ;;  %s5725_s3 = inlined_call_operand.vmem [shape: s8[2,8,8], index: 3, kind: input, shape index: {}]   ;;  %s5726_s4 = inlined_call_operand.vmem [shape: bf16[3,4,32,8], index: 4, kind: input, shape index: {}]   ;;  %s5727_s5 = inlined_call_operand.vmem [shape: f32[3,4,1,8], index: 5, kind: input, shape index: {}]   ;;  %s5728_s6 = inlined_call_operand.vmem [shape: bf16[4,8,32], index: 6, kind: input, shape index: {}]   ;;  %s5729_s7 = inlined_call_operand.vmem [shape: f32[1,32], index: 7, kind: input, shape index: {}]   ;;  %s5730_s8 = inlined_call_operand.vmem [shape: f32[1,32], index: 8, kind: input, shape index: {}]   ;;  %s5731_s9 = inlined_call_operand.vmem [shape: f32[1,32], index: 9, kind: input, shape index: {}]   ;;  %s5732_s10 = inlined_call_operand.vmem [shape: bf16[4,32,8], index: 10, kind: input, shape index: {}]   ;;  %s5733_s11 = inlined_call_operand.vmem [shape: f32[4,1,8], index: 11, kind: input, shape index: {}]   ;;  %s5734_s12 = inlined_call_operand.vmem [shape: bf16[2,4,32,8], index: 12, kind: input, shape index: {}]   ;;  %s5735_s13 = inlined_call_operand.vmem [shape: f32[2,4,1,8], index: 13, kind: input, shape index: {}]   ;;  %s5736_s14 = inlined_call_operand.vmem [shape: bf16[4,8,32], index: 14, kind: input, shape index: {}]   ;;  %s5737_s15 = inlined_call_operand.vmem [shape: f32[1,32], index: 15, kind: input, shape index: {}]   ;;  %s5738_s16 = inlined_call_operand.vmem [shape: f32[1,32], index: 16, kind: input, shape index: {}]   ;;  %s5739_s17 = inlined_call_operand.vmem [shape: f32[1,32], index: 17, kind: input, shape index: {}]   ;;  %s5740_s18 = inlined_call_operand.vmem [shape: bf16[32,64], index: 18, kind: input, shape index: {}]   ;;  %s5741_s19 = inlined_call_operand.vmem [shape: f32[1,64], index: 19, kind: input, shape index: {}]   ;;  %s5742_s20 = inlined_call_operand.vmem [shape: bf16[64,32], index: 20, kind: input, shape index: {}]   ;;  %s5743_s21 = inlined_call_operand.vmem [shape: f32[1,32], index: 21, kind: input, shape index: {}]   ;;  %s5744_s22 = inlined_call_operand.vmem [shape: f32[1,32], index: 22, kind: input, shape index: {}]   ;;  %s5745_s23 = inlined_call_operand.vmem [shape: f32[1,32], index: 23, kind: input, shape index: {}]   ;;  %s5746_s24 = inlined_call_operand.hbm [shape: bf16[2,8,32], index: 24, kind: output, shape index: {}]  }
   0x1   :  { %5760 = sst [smem:[#allocation10_spill]] %s5722_s0 }
   0x2   :  { %5761 = sst [smem:[#allocation11_spill]] %s5723_s1 }
   0x3   :  { %5762 = sst [smem:[#allocation12_spill]] %s5724_s2 }
   0x4   :  { %5763 = sst [smem:[#allocation13_spill]] %s5725_s3 }
   0x5   :  { %5764 = sst [smem:[#allocation14_spill]] %s5726_s4 }
   0x6   :  { %5765 = sst [smem:[#allocation15_spill]] %s5727_s5 }
   0x7   :  { %5766 = sst [smem:[#allocation16_spill]] %s5728_s6 }
   0x8   :  { %5767 = sst [smem:[#allocation17_spill]] %s5729_s7 }
   0x9   :  { %5768 = sst [smem:[#allocation18_spill]] %s5730_s8 }
   0xa   :  { %5769 = sst [smem:[#allocation19_spill]] %s5731_s9 }
   0xb   :  { %29 = vsyncpa [#allocation3], 0 }
   0xc   :  { %31 = vsyncpa [#allocation3 + $0x1], 0  ;;  %s4992_s5 = smov 0   ;;  %s4994_s26 = smov 0  }
   0xd   :  { %s4996_s27 = smov 0   ;;  %s4998_s28 = smov 0  }
   0xe LB: > { %5770 = sst [smem:[#allocation5_spill]] %s4850_s5  ;;  %s5013_s6 = sadd.s32 4294967295, %s4862_s28   ;;  %s4862_s28 = sphi %s4998_s28, %s5791_s28   ;;  %s4858_s27 = sphi %s4996_s27, %s5793_s27   ;;  %s4854_s26 = sphi %s4994_s26, %s5795_s26   ;;  %s4850_s5 = sphi %s4992_s5, %s5794_s5  }
   0xf   : > { %5771 = sst [smem:[#allocation6_spill]] %s4858_s27  ;;  %s3972_s2 = sadd.s32 4294967294, %s4862_s28  }
  0x10   : > { %s5017_s29 = sadd.s32 1, %s4862_s28   ;;  %s568_s0 = sadd.s32 1, %s4858_s27 }
  0x11   : > { %5772 = sst [smem:[#allocation7_spill]] %s5017_s29  ;;  %s565_s7 = ssub.s32 %s4862_s28, %s5017_s29 }
  0x12   : > { %p578_p0 = scmp.ne.s32.totalorder %s4858_s27, %s4854_s26  ;;  %p566_p1 = scmp.eq.s32.totalorder %s565_s7, 0 }
  0x13   : > { %p579_p2 = scmp.eq.s32.totalorder %s5013_s6, 1  ;;  %p584_p3 = scmp.ne.s32.totalorder %s4854_s26, %s4850_s5 }
  0x14   : > { %p585_p4 = scmp.eq.s32.totalorder %s3972_s2, 1  ;;  %p3975_p7 = scmp.ge.s32.totalorder %s4862_s28, 1 }
  0x15   : > { %s5028_s30 = scalar_select %p566_p1, %s4858_s27, %s568_s0  }
  0x16   : > { %p5030_p5 = por %p579_p2, %p578_p0  ;;  %p5034_p6 = por %p585_p4, %p584_p3 }
  0x17   : > { %5773 = sst [smem:[#allocation8_spill]] %s5028_s30  ;;  %p691_p8 = scmp.lt.s32.totalorder %s4862_s28, 3 }
  0x18   : > { %s5775_s25 = scalar_select %p5034_p6, 1, 0 }
  0x19   : > { %p692_p9 = pnand %p3975_p7, %p691_p8 }
  0x1a   : > { %5776 = sst [smem:[#allocation9_spill]] %s5775_s25  ;;  %s5777_s1 = sld [smem:[#allocation14_spill]] (!%p692_p9)  ;;  %v4864_v1 = vmov (!%p692_p9), 0.0   ;;  %vm4865_vm0 = vmmov (!%p692_p9), 0   ;;  %vm898_vm1 = vcmask (!%p692_p9), 261120   ;;  %vm1570_vm2 = vcmask (!%p692_p9), 64512  }
  0x1b   : > { %695 = sbr.rel (%p692_p9) target bundleno = 3864 (0xf18), region = 116  ;;  %4311 = vmatprep.subr.bf16.mxu0 (!%p692_p9), %v4864_v1  ;;  %4319 = vmatprep.subr.bf16.mxu1 (!%p692_p9), %v4864_v1  ;;  %p768_p10 = scmp.lt.s32.totalorder (!%p692_p9), %s5013_s6, 1  ;;  %vm1821_vm3 = vcmask (!%p692_p9), 1043456   ;;  %vm3786_vm6 = vcmask (!%p692_p9), 523264   ;;  %vm3861_vm7 = vcmask (!%p692_p9), 257024  }
  0x1c   : > { %4315 = vmatprep.mubr.msk.bf16.mxu0 (!%p692_p9), %vm4865_vm0, %v4864_v1  ;;  %4323 = vmatprep.mubr.msk.bf16.mxu1 (!%p692_p9), %vm4865_vm0, %v4864_v1  ;;  %s5778_s27 = sld [smem:[#allocation10_spill]] (!%p692_p9)  ;;  %s5779_s8 = sld [smem:[#allocation15_spill]] (!%p692_p9) }
  0x1d   : > { %s5780_s4 = sld [smem:[#allocation12_spill]] (!%p692_p9)  ;;  %s5781_s7 = sld [smem:[#allocation16_spill]] (!%p692_p9) }
  0x1e   : > { %s5784_s9 = sld [smem:[#allocation19_spill]] (!%p692_p9) }
  0x20   : > { %v4708_v0 = vld [vmem:[%s5777_s1] sm:$0xff] (!%p692_p9)   ;;  %v4709_v2 = vld [vmem:[%s5777_s1 + $0x10] sm:$0xff] (!%p692_p9)   ;;  %v4710_v3 = vld [vmem:[%s5777_s1 + $0x8] sm:$0xff] (!%p692_p9)  }
  0x21   : > { %4312 = vmatpush3.bf16.msra.mxu0 (!%p692_p9), %v4708_v0  ;;  %4320 = vmatpush3.bf16.msra.mxu1 (!%p692_p9), %v4709_v2  ;;  %v4711_v4 = vld [vmem:[%s5777_s1 + $0x18] sm:$0xff] (!%p692_p9)   ;;  %v4712_v5 = vld [vmem:[%s5777_s1 + $0x20] sm:$0xff] (!%p692_p9)   ;;  %v4713_v6 = vld [vmem:[%s5777_s1 + $0x30] sm:$0xff] (!%p692_p9)  }
  0x22   : > { %4313 = vmatprep.subr.bf16.mxu0 %v4864_v1  ;;  %4321 = vmatprep.subr.bf16.mxu1 %v4864_v1  ;;  %s5062_s2 = scalar_select %p768_p10, %s5013_s6, 1  ;;  %v4714_v8 = vld [vmem:[%s5777_s1 + $0x28] sm:$0xff]   ;;  %v4715_v9 = vld [vmem:[%s5777_s1 + $0x38] sm:$0xff]   ;;  %v4716_v10 = vld [vmem:[%s5777_s1 + $0x40] sm:$0xff]  }
  0x23   : > { %v4717_v11 = vld [vmem:[%s5777_s1 + $0x50] sm:$0xff]   ;;  %v4718_v12 = vld [vmem:[%s5777_s1 + $0x48] sm:$0xff]   ;;  %v4719_v13 = vld [vmem:[%s5777_s1 + $0x58] sm:$0xff]  }
  0x24   : > { %s5756_s30 = sshll.u32 %s5062_s2, 2  ;;  %v4720_v14 = vld [vmem:[%s5777_s1 + $0x60] sm:$0xff]   ;;  %v4721_v15 = vld [vmem:[%s5777_s1 + $0x70] sm:$0xff]   ;;  %v4722_v16 = vld [vmem:[%s5777_s1 + $0x68] sm:$0xff]  }
  0x25   : > { %4314 = vmatpush3.bf16.msra.mxu0 %v4710_v3  ;;  %4322 = vmatpush3.bf16.msra.mxu1 %v4711_v4  ;;  %s771_s29 = scalar_lea.vmem %s5778_s27, %s5756_s30  ;;  %v4723_v17 = vld [vmem:[%s5777_s1 + $0x78] sm:$0xff]   ;;  %v4724_v18 = vld [vmem:[%s5777_s1 + $0x80] sm:$0xff]   ;;  %v4725_v19 = vld [vmem:[%s5777_s1 + $0x90] sm:$0xff]   ;;  %s5755_s27 = sshll.u32 %s5062_s2, 1 }
  0x26   : > { %4327 = vmatprep.subr.bf16.mxu0 %v4864_v1  ;;  %v5077_v7 = vld [vmem:[%s771_s29] sm:$0xf]  ;;  %4335 = vmatprep.subr.bf16.mxu1 %v4864_v1  ;;  %v4726_v20 = vld [vmem:[%s5777_s1 + $0x88] sm:$0xff]   ;;  %v4727_v21 = vld [vmem:[%s5777_s1 + $0x98] sm:$0xff]   ;;  %s779_s0 = scalar_lea.vmem %s5780_s4, %s5755_s27  ;;  %s5782_s29 = sld [smem:[#allocation17_spill]] }
  0x27   : > { %v4728_v22 = vld [vmem:[%s5777_s1 + $0xa0] sm:$0xff]   ;;  %v4729_v23 = vld [vmem:[%s5777_s1 + $0xb0] sm:$0xff]   ;;  %v4730_v24 = vld [vmem:[%s5777_s1 + $0xa8] sm:$0xff]   ;;  %s5786_s27 = sld [smem:[#allocation11_spill]]  ;;  %s5788_s4 = sld [smem:[#allocation13_spill]] }
  0x28   : > { %4316 = vmatmul.mubr.msk.bf16.vlgmr.msra.gmra.mrb[0].mxu0 %vm898_vm1, %v5077_v7  ;;  %4324 = vmatmul.mubr.msk.bf16.vlgmr.msra.gmra.mrb[0].mxu1 %vm898_vm1, %v5077_v7  ;;  %v4731_v25 = vld [vmem:[%s5777_s1 + $0xb8] sm:$0xff]   ;;  %v4037_v42 = vld [vmem:[%s5779_s8 + $0x4] ss:$0 sm:$0xff]  ;;  %v4038_v43 = vld [vmem:[%s5779_s8 + $0x5] ss:$0 sm:$0xff]  ;;  %s5785_s1 = sshll.u32 %s5062_s2, 2 }
  0x29   : > { %4328 = vmatpush3.bf16.msra.mxu0 %v4712_v5  ;;  %4336 = vmatpush3.bf16.msra.mxu1 %v4713_v6  ;;  %v4021_v54 = vld [vmem:[%s5779_s8] ss:$0 sm:$0xff]  ;;  %v4022_v57 = vld [vmem:[%s5779_s8 + $0x1] ss:$0 sm:$0xff]  ;;  %v4039_v60 = vld [vmem:[%s5779_s8 + $0x6] ss:$0 sm:$0xff] }
  0x2a   : > { %4329 = vmatprep.subr.bf16.mxu0 %v4864_v1  ;;  %4337 = vmatprep.subr.bf16.mxu1 %v4864_v1  ;;  %v4040_v62 = vld [vmem:[%s5779_s8 + $0x7] ss:$0 sm:$0xff] }
  0x2b   : > { %4331 = vmatprep.mubr.msk.bf16.mxu0 %vm4865_vm0, %v4864_v1  ;;  %4339 = vmatprep.mubr.msk.bf16.mxu1 %vm4865_vm0, %v4864_v1 }
  0x2d   : > { %4330 = vmatpush3.bf16.msra.mxu0 %v4714_v8  ;;  %4338 = vmatpush3.bf16.msra.mxu1 %v4715_v9  ;;  %s775_s5 = scalar_lea.vmem %s5786_s27, %s5785_s1  ;;  %s765_s27 = sand.u32 1, %s4854_s26  }
  0x2e   : > { %4343 = vmatprep.subr.bf16.mxu0 %v4864_v1  ;;  %4351 = vmatprep.subr.bf16.mxu1 %v4864_v1 }
  0x30   : > { %4332 = vmatmul.mubr.msk.bf16.vlgmr.msra.gmra.mrb[4].mxu0 %vm898_vm1, %v5077_v7  ;;  %4340 = vmatmul.mubr.msk.bf16.vlgmr.msra.gmra.mrb[4].mxu1 %vm898_vm1, %v5077_v7 }
  0x31   : > { %4344 = vmatpush3.bf16.msra.mxu0 %v4716_v10  ;;  %4352 = vmatpush3.bf16.msra.mxu1 %v4717_v11 }
  0x32   : > { %4345 = vmatprep.subr.bf16.mxu0 %v4864_v1  ;;  %4353 = vmatprep.subr.bf16.mxu1 %v4864_v1 }
  0x33   : > { %4347 = vmatprep.mubr.msk.bf16.mxu0 %vm4865_vm0, %v4864_v1  ;;  %4355 = vmatprep.mubr.msk.bf16.mxu1 %vm4865_vm0, %v4864_v1 }
  0x35   : > { %4346 = vmatpush3.bf16.msra.mxu0 %v4718_v12  ;;  %4354 = vmatpush3.bf16.msra.mxu1 %v4719_v13 }
  0x36   : > { %4359 = vmatprep.subr.bf16.mxu0 %v4864_v1  ;;  %4367 = vmatprep.subr.bf16.mxu1 %v4864_v1 }
  0x38   : > { %4348 = vmatmul.mubr.msk.bf16.vlgmr.msra.gmra.mrb[8].mxu0 %vm898_vm1, %v5077_v7  ;;  %4356 = vmatmul.mubr.msk.bf16.vlgmr.msra.gmra.mrb[8].mxu1 %vm898_vm1, %v5077_v7 }
  0x39   : > { %4360 = vmatpush3.bf16.msra.mxu0 %v4720_v14  ;;  %4368 = vmatpush3.bf16.msra.mxu1 %v4721_v15  ;;  %v4023_v14 = vld [vmem:[%s5779_s8 + $0x2] ss:$0 sm:$0xff] }
  0x3a   : > { %4361 = vmatprep.subr.bf16.mxu0 %v4864_v1  ;;  %4369 = vmatprep.subr.bf16.mxu1 %v4864_v1 }
  0x3b   : > { %4363 = vmatprep.mubr.msk.bf16.mxu0 %vm4865_vm0, %v4864_v1  ;;  %4371 = vmatprep.mubr.msk.bf16.mxu1 %vm4865_vm0, %v4864_v1 }
  0x3d   : > { %4362 = vmatpush3.bf16.msra.mxu0 %v4722_v16  ;;  %4370 = vmatpush3.bf16.msra.mxu1 %v4723_v17  ;;  %v4024_v17 = vld [vmem:[%s5779_s8 + $0x3] ss:$0 sm:$0xff] }
  0x3e   : > { %4375 = vmatprep.subr.bf16.mxu0 %v4864_v1  ;;  %4383 = vmatprep.subr.bf16.mxu1 %v4864_v1 }
  0x40   : > { %4364 = vmatmul.mubr.msk.bf16.vlgmr.msra.gmra.mrb[12].mxu0 %vm898_vm1, %v5077_v7  ;;  %4372 = vmatmul.mubr.msk.bf16.vlgmr.msra.gmra.mrb[12].mxu1 %vm898_vm1, %v5077_v7 }
  0x41   : > { %4376 = vmatpush3.bf16.msra.mxu0 %v4724_v18  ;;  %4379 = vmatprep.mubr.msk.bf16.mxu0 %vm4865_vm0, %v4864_v1 }
  0x42   : > { %4377 = vmatprep.subr.bf16.mxu0 %v4864_v1  ;;  %4387 = vmatprep.mubr.msk.bf16.mxu1 %vm4865_vm0, %v4864_v1 }
  0x43   : > { %4384 = vmatpush3.bf16.msra.mxu1 %v4725_v19 }
  0x44   : > { %4385 = vmatprep.subr.bf16.mxu1 %v4864_v1 }
  0x45   : > { %4378 = vmatpush3.bf16.msra.mxu0 %v4726_v20 }
  0x46   : > { %4391 = vmatprep.subr.bf16.mxu0 %v4864_v1 }
  0x47   : > { %4386 = vmatpush3.bf16.msra.mxu1 %v4727_v21 }
  0x48   : > { %4380 = vmatmul.mubr.msk.bf16.vlgmr.msra.gmra.mrb[16].mxu0 %vm898_vm1, %v5077_v7  ;;  %4399 = vmatprep.subr.bf16.mxu1 %v4864_v1 }
  0x49   : > { %4395 = vmatprep.mubr.msk.bf16.mxu0 %vm4865_vm0, %v4864_v1  ;;  %4392 = vmatpush3.bf16.msra.mxu0 %v4728_v22 }
  0x4a   : > { %4388 = vmatmul.mubr.msk.bf16.vlgmr.msra.gmra.mrb[16].mxu1 %vm898_vm1, %v5077_v7  ;;  %4393 = vmatprep.subr.bf16.mxu0 %v4864_v1 }
  0x4b   : > { %4400 = vmatpush3.bf16.msra.mxu1 %v4729_v23  ;;  %4403 = vmatprep.mubr.msk.bf16.mxu1 %vm4865_vm0, %v4864_v1 }
  0x4c   : > { %4401 = vmatprep.subr.bf16.mxu1 %v4864_v1 }
  0x4d   : > { %4394 = vmatpush3.bf16.msra.mxu0 %v4730_v24  ;;  %v4053_v24 = vld [vmem:[%s5779_s8 + $0x8] ss:$0 sm:$0xff] }
  0x4e   : > { %4407 = vmatprep.subr.bf16.mxu0 %v4864_v1 }
  0x4f   : > { %4402 = vmatpush3.bf16.msra.mxu1 %v4731_v25 }
  0x50   : > { %4413 = vmatprep.subr.bf16.mxu1 %v4864_v1  ;;  %4396 = vmatmul.mubr.msk.bf16.vlgmr.msra.gmra.mrb[20].mxu0 %vm898_vm1, %v5077_v7 }
  0x51   : > { %4409 = vmatprep.mubr.msk.bf16.mxu0 %vm4865_vm0, %v4864_v1 }
  0x52   : > { %4404 = vmatmul.mubr.msk.bf16.vlgmr.msra.gmra.mrb[20].mxu1 %vm898_vm1, %v5077_v7 }
  0x53   : > { %4415 = vmatprep.mubr.msk.bf16.mxu1 %vm4865_vm0, %v4864_v1 }
  0xfb   : > { %v936_v26 = vpop.f32.mrb[0].mxu0  ;;  %v988_v28 = vpop.f32.mrb[0].mxu1 }
  0xfc   : > { %v4317_v27 = vpop.f32.mrb[1].mxu0  ;;  %v4325_v30 = vpop.f32.mrb[1].mxu1  ;;  %v937_v61 = vadd.f32 %v4021_v54, %v936_v26  ;;  %v989_v63 = vadd.f32 %v4022_v57, %v988_v28  ;;  %v4054_v26 = vld [vmem:[%s5779_s8 + $0x9] ss:$0 sm:$0xff] }
  0xfd   : > { %v939_v29 = vpop.f32.mrb[2].mxu0  ;;  %v991_v32 = vpop.f32.mrb[2].mxu1 }
  0xfe   : > { %v4318_v31 = vpop.f32.mrb[3].mxu0  ;;  %v4326_v33 = vpop.f32.mrb[3].mxu1  ;;  %v1562_v9 = vpack.c.bf16 %v937_v61, %v937_v61  ;;  %v1563_v13 = vpack.c.bf16 %v989_v63, %v989_v63 }
 0x103   : > { %v1040_v34 = vpop.f32.mrb[4].mxu0  ;;  %v1092_v36 = vpop.f32.mrb[4].mxu1 }
 0x104   : > { %v4333_v35 = vpop.f32.mrb[5].mxu0  ;;  %v4341_v38 = vpop.f32.mrb[5].mxu1  ;;  %v1041_v20 = vadd.f32 %v4023_v14, %v1040_v34  ;;  %v1093_v21 = vadd.f32 %v4024_v17, %v1092_v36 }
 0x105   : > { %v1043_v37 = vpop.f32.mrb[6].mxu0  ;;  %v1095_v40 = vpop.f32.mrb[6].mxu1 }
 0x106   : > { %v4334_v39 = vpop.f32.mrb[7].mxu0  ;;  %v4342_v41 = vpop.f32.mrb[7].mxu1  ;;  %v1564_v22 = vpack.c.bf16 %v1041_v20, %v1041_v20  ;;  %v1565_v23 = vpack.c.bf16 %v1093_v21, %v1093_v21 }
 0x10b   : > { %v1168_v44 = vpop.f32.mrb[8].mxu0  ;;  %v1220_v46 = vpop.f32.mrb[8].mxu1 }
 0x10c   : > { %v1169_v45 = vadd.f32 %v4037_v42, %v1168_v44  ;;  %v4349_v47 = vpop.f32.mrb[9].mxu0  ;;  %v1221_v48 = vadd.f32 %v4038_v43, %v1220_v46  ;;  %v4357_v50 = vpop.f32.mrb[9].mxu1 }
 0x10d   : > { %v1171_v49 = vpop.f32.mrb[10].mxu0  ;;  %v1223_v53 = vpop.f32.mrb[10].mxu1 }
 0x10e   : > { %v1566_v51 = vpack.c.bf16 %v1169_v45, %v1169_v45  ;;  %v4350_v52 = vpop.f32.mrb[11].mxu0  ;;  %v1567_v55 = vpack.c.bf16 %v1221_v48, %v1221_v48  ;;  %v4358_v56 = vpop.f32.mrb[11].mxu1  ;;  %v787_v48 = vld [vmem:[%s779_s0] sm:$0x3]  ;;  %s5783_s0 = sld [smem:[#allocation18_spill]] }
 0x10f   : > { %v788_v49 = vunpack.c.0.s8 %v787_v48 }
 0x110   : > { %v1575_v58 = vsel %vm1570_vm2, %v1566_v51, 0  ;;  %v1621_v59 = vsel %vm1570_vm2, %v1567_v55, 0 }
 0x111   : > { %4408 = vmatpush3.bf16.xpose.msra.mxu0 %v1575_v58  ;;  %4414 = vmatpush3.bf16.xpose.msra.mxu1 %v1621_v59  ;;  %v789_v50 = vcvt.s32.f32 %v788_v49 }
 0x112   : > { %4419 = vmatprep.subr.bf16.mxu0 %v4864_v1  ;;  %4425 = vmatprep.subr.bf16.mxu1 %v4864_v1 }
 0x113   : > { %v1272_v0 = vpop.f32.mrb[12].mxu0  ;;  %v1324_v3 = vpop.f32.mrb[12].mxu1  ;;  %vm1759_vm4 = vcmp.eq.f32.partialorder %v789_v50, 0.0 }
 0x114   : > { %v1273_v2 = vadd.f32 %v4039_v60, %v1272_v0  ;;  %v4365_v4 = vpop.f32.mrb[13].mxu0  ;;  %v1325_v5 = vadd.f32 %v4040_v62, %v1324_v3  ;;  %v4373_v8 = vpop.f32.mrb[13].mxu1 }
 0x115   : > { %v1275_v6 = vpop.f32.mrb[14].mxu0  ;;  %v1327_v12 = vpop.f32.mrb[14].mxu1 }
 0x116   : > { %v1568_v10 = vpack.c.bf16 %v1273_v2, %v1273_v2  ;;  %v4366_v11 = vpop.f32.mrb[15].mxu0  ;;  %v1569_v15 = vpack.c.bf16 %v1325_v5, %v1325_v5  ;;  %v4374_v16 = vpop.f32.mrb[15].mxu1 }
 0x118   : > { %v1667_v18 = vsel %vm1570_vm2, %v1568_v10, 0  ;;  %4410 = vmatmul.mubr.msk.bf16.vlgmr.msra.gmra.mrb[24].mxu0 %vm1570_vm2, %v1562_v9  ;;  %v1713_v19 = vsel %vm1570_vm2, %v1569_v15, 0  ;;  %4416 = vmatmul.mubr.msk.bf16.vlgmr.msra.gmra.mrb[24].mxu1 %vm1570_vm2, %v1563_v13 }
 0x119   : > { %4420 = vmatpush3.bf16.xpose.msra.mxu0 %v1667_v18  ;;  %4426 = vmatpush3.bf16.xpose.msra.mxu1 %v1713_v19 }
 0x11a   : > { %4421 = vmatprep.mubr.msk.bf16.mxu0 %vm4865_vm0, %v4864_v1  ;;  %4427 = vmatprep.mubr.msk.bf16.mxu1 %vm4865_vm0, %v4864_v1 }
 0x11b   : > { %4431 = vmatprep.subr.bf16.mxu0 %v4864_v1  ;;  %4437 = vmatprep.subr.bf16.mxu1 %v4864_v1  ;;  %v1400_v25 = vpop.f32.mrb[16].mxu0 }
 0x11c   : > { %v1401_v27 = vadd.f32 %v4053_v24, %v1400_v25  ;;  %v4381_v28 = vpop.f32.mrb[17].mxu0 }
 0x11d   : > { %v1403_v29 = vpop.f32.mrb[18].mxu0  ;;  %v1452_v30 = vpop.f32.mrb[16].mxu1 }
 0x11e   : > { %v1814_v31 = vpack.c.bf16 %v1401_v27, %v1401_v27  ;;  %v4382_v32 = vpop.f32.mrb[19].mxu0  ;;  %v1453_v33 = vadd.f32 %v4054_v26, %v1452_v30  ;;  %v4389_v34 = vpop.f32.mrb[17].mxu1 }
 0x11f   : > { %v1455_v35 = vpop.f32.mrb[18].mxu1 }
 0x120   : > { %4422 = vmatmul.mubr.msk.bf16.vlgmr.msra.gmra.mrb[28].mxu0 %vm1570_vm2, %v1564_v22  ;;  %4428 = vmatmul.mubr.msk.bf16.vlgmr.msra.gmra.mrb[28].mxu1 %vm1570_vm2, %v1565_v23  ;;  %v1823_v36 = vsel %vm1821_vm3, %v1814_v31, 0  ;;  %v1815_v37 = vpack.c.bf16 %v1453_v33, %v1453_v33  ;;  %v4390_v38 = vpop.f32.mrb[19].mxu1 }
 0x121   : > { %4433 = vmatprep.mubr.msk.bf16.mxu0 %vm4865_vm0, %v4864_v1  ;;  %4439 = vmatprep.mubr.msk.bf16.mxu1 %vm4865_vm0, %v4864_v1 }
 0x122   : > { %4432 = vmatpush3.bf16.msra.mxu0 %v1823_v36  ;;  %v1869_v39 = vsel %vm1821_vm3, %v1815_v37, 0 }
 0x123   : > { %4443 = vmatprep.subr.bf16.mxu0 %v4864_v1  ;;  %4438 = vmatpush3.bf16.msra.mxu1 %v1869_v39  ;;  %v5256_v40 = vpop.f32.mrb[20].mxu0  ;;  %v4055_v39 = vld [vmem:[%s5779_s8 + $0xa] ss:$0 sm:$0xff] }
 0x124   : > { %4449 = vmatprep.subr.bf16.mxu1 %v4864_v1  ;;  %v4397_v42 = vpop.f32.mrb[21].mxu0 }
 0x125   : > { %v5258_v41 = vpop.f32.mrb[20].mxu1  ;;  %v1507_v44 = vpop.f32.mrb[22].mxu0  ;;  %v1505_v42 = vadd.f32 %v4055_v39, %v5256_v40 }
 0x126   : > { %v4405_v43 = vpop.f32.mrb[21].mxu1  ;;  %v4398_v46 = vpop.f32.mrb[23].mxu0  ;;  %v4056_v44 = vld [vmem:[%s5779_s8 + $0xb] ss:$0 sm:$0xff] }
 0x127   : > { %v1559_v45 = vpop.f32.mrb[22].mxu1  ;;  %v1816_v46 = vpack.c.bf16 %v1505_v42, %v1505_v42 }
 0x128   : > { %v4406_v47 = vpop.f32.mrb[23].mxu1 }
 0x129   : > { %v1557_v47 = vadd.f32 %v4056_v44, %v5258_v41  ;;  %v858_v41 = vld [vmem:[%s5781_s7] sm:$0xf] }
 0x1eb   : > { %v1611_v51 = vpop.f32.mrb[24].mxu0  ;;  %v1657_v53 = vpop.f32.mrb[24].mxu1 }
 0x1ec   : > { %v1755_v52 = vmul.f32 0.35355338, %v1611_v51  ;;  %v4411_v54 = vpop.f32.mrb[25].mxu0  ;;  %v1756_v55 = vmul.f32 0.35355338, %v1657_v53  ;;  %v4417_v56 = vpop.f32.mrb[25].mxu1  ;;  %v1817_v53 = vpack.c.bf16 %v1557_v47, %v1557_v47 }
 0x1ed   : > { %v1614_v57 = vpop.f32.mrb[26].mxu0  ;;  %v1660_v58 = vpop.f32.mrb[26].mxu1 }
 0x1ee   : > { %v4412_v59 = vpop.f32.mrb[27].mxu0  ;;  %v1762_v60 = vsel %vm1759_vm4, -10000.0, %v1755_v52  ;;  %v4418_v61 = vpop.f32.mrb[27].mxu1  ;;  %v1763_v63 = vsel %vm1759_vm4, -10000.0, %v1756_v55  ;;  %v1915_v52 = vsel %vm1821_vm3, %v1816_v46, 0  ;;  %v1961_v56 = vsel %vm1821_vm3, %v1817_v53, 0 }
 0x1ef   : > { %v1766_v62 = vsel %vm1570_vm2, %v1762_v60, -inf  ;;  %v1769_v2 = vsel %vm1570_vm2, %v1763_v63, -inf  ;;  %v2011_v59 = vsel %vm1821_vm3, %v858_v41, 0 }
 0x1f0   : > { %1767 = vmax.xlane.f32.xlu0 %v1766_v62 }
 0x1f3   : > { %v1703_v0 = vpop.f32.mrb[28].mxu0  ;;  %v1749_v4 = vpop.f32.mrb[28].mxu1 }
 0x1f4   : > { %v1757_v3 = vmul.f32 0.35355338, %v1703_v0  ;;  %1770 = vmax.xlane.f32.xlu0 %v1769_v2  ;;  %v4423_v5 = vpop.f32.mrb[29].mxu0  ;;  %v1758_v6 = vmul.f32 0.35355338, %v1749_v4  ;;  %v4429_v8 = vpop.f32.mrb[29].mxu1 }
 0x1f5   : > { %v1706_v9 = vpop.f32.mrb[30].mxu0  ;;  %v1752_v10 = vpop.f32.mrb[30].mxu1  ;;  %v860_v2 = vld [vmem:[%s5781_s7 + $0x8] sm:$0xf] }
 0x1f6   : > { %v4424_v11 = vpop.f32.mrb[31].mxu0  ;;  %v1764_v12 = vsel %vm1759_vm4, -10000.0, %v1757_v3  ;;  %v4430_v13 = vpop.f32.mrb[31].mxu1  ;;  %v1765_v15 = vsel %vm1759_vm4, -10000.0, %v1758_v6  ;;  %v2103_v6 = vsel %vm1821_vm3, %v860_v2, 0 }
 0x1f7   : > { %v1772_v14 = vsel %vm1570_vm2, %v1764_v12, -inf  ;;  %v1775_v16 = vsel %vm1570_vm2, %v1765_v15, -inf  ;;  %v861_v9 = vld [vmem:[%s5781_s7 + $0xc] sm:$0xf] }
 0x1f8   : > { %1773 = vmax.xlane.f32.xlu1 %v1772_v14  ;;  %v2149_v14 = vsel %vm1821_vm3, %v861_v9, 0 }
 0x1fc   : > { %1776 = vmax.xlane.f32.xlu1 %v1775_v16 }
 0x27d   : > { %v1768_v17 = vpop.xlane.xlu0 %1767 }
 0x27e   : > { %v1778_v18 = vsub.f32 %v1762_v60, %v1768_v17 }
 0x280   : > { %v1782_v19 = vmul.f32 1.442695, %v1778_v18 }
 0x281   : > { %v1771_v20 = vpop.xlane.xlu0 %1770 }
 0x282   : > { %4762 = vpow2.f32 %v1782_v19  ;;  %v1779_v21 = vsub.f32 %v1763_v63, %v1771_v20  ;;  %v859_v63 = vld [vmem:[%s5781_s7 + $0x4] sm:$0xf] }
 0x283   : > { %v2057_v0 = vsel %vm1821_vm3, %v859_v63, 0 }
 0x284   : > { %v1784_v22 = vmul.f32 1.442695, %v1779_v21 }
 0x285   : > { %v1774_v23 = vpop.xlane.xlu1 %1773 }
 0x286   : > { %4764 = vpow2.f32 %v1784_v22  ;;  %v1780_v24 = vsub.f32 %v1764_v12, %v1774_v23 }
 0x288   : > { %v1786_v25 = vmul.f32 1.442695, %v1780_v24 }
 0x289   : > { %v1777_v26 = vpop.xlane.xlu1 %1776 }
 0x28a   : > { %4766 = vpow2.f32 %v1786_v25  ;;  %v1781_v27 = vsub.f32 %v1765_v15, %v1777_v26 }
 0x28c   : > { %v4763_v28 = vpop.eup %4762  ;;  %v1788_v29 = vmul.f32 1.442695, %v1781_v27 }
 0x28d   : > { %v1790_v30 = vsel %vm1570_vm2, %v4763_v28, 0.0 }
 0x28e   : > { %4768 = vpow2.f32 %v1788_v29  ;;  %1791 = vadd.xlane.f32.xlu0 %v1790_v30 }
 0x290   : > { %v4765_v31 = vpop.eup %4764 }
 0x291   : > { %v1793_v32 = vsel %vm1570_vm2, %v4765_v31, 0.0 }
 0x292   : > { %1794 = vadd.xlane.f32.xlu1 %v1793_v32 }
 0x294   : > { %v4767_v33 = vpop.eup %4766 }
 0x295   : > { %v1796_v34 = vsel %vm1570_vm2, %v4767_v33, 0.0 }
 0x296   : > { %1797 = vadd.xlane.f32.xlu0 %v1796_v34 }
 0x298   : > { %v4769_v35 = vpop.eup %4768 }
 0x299   : > { %v1799_v36 = vsel %vm1570_vm2, %v4769_v35, 0.0 }
 0x29a   : > { %1800 = vadd.xlane.f32.xlu1 %v1799_v36 }
 0x31b   : > { %v1792_v37 = vpop.xlane.xlu0 %1791 }
 0x31c   : > { %4770 = vrcp.f32 %v1792_v37 }
 0x31f   : > { %v1795_v38 = vpop.xlane.xlu1 %1794 }
 0x320   : > { %4772 = vrcp.f32 %v1795_v38 }
 0x323   : > { %v1798_v43 = vpop.xlane.xlu0 %1797 }
 0x324   : > { %4774 = vrcp.f32 %v1798_v43 }
 0x326   : > { %v4771_v45 = vpop.eup %4770 }
 0x327   : > { %v1806_v48 = vmul.f32 %v4771_v45, %v4763_v28  ;;  %v1801_v49 = vpop.xlane.xlu1 %1800 }
 0x328   : > { %4776 = vrcp.f32 %v1801_v49 }
 0x329   : > { %v1810_v50 = vpack.c.bf16 %v1806_v48, %v1806_v48  ;;  %v4081_v48 = vld [vmem:[%s5782_s29] ss:$0 sm:$0xff]  ;;  %s3864_s29 = scalar_lea.sflag [#allocation3], %s765_s27 }
 0x32a   : > { %v4773_v51 = vpop.eup %4772 }
 0x32b   : > { %v1807_v54 = vmul.f32 %v4773_v51, %v4765_v31  ;;  %4434 = vmatmul.mubr.msk.bf16.vlgmr.msra.gmra.mrb[32].mxu0 %vm1570_vm2, %v1810_v50 }
 0x32c   : > { %4444 = vmatpush3.bf16.msra.mxu0 %v1915_v52  ;;  %4445 = vmatprep.mubr.msk.bf16.mxu0 %vm4865_vm0, %v4864_v1  ;;  %v793_v52 = vunpack.c.l.bf16 %v5077_v7  ;;  %v4733_v7 = vld [vmem:[%s5732_s10 + $0x10] sm:$0xff]  }
 0x32d   : > { %v1811_v40 = vpack.c.bf16 %v1807_v54, %v1807_v54  ;;  %4455 = vmatprep.subr.bf16.mxu0 %v4864_v1 }
 0x32e   : > { %v4775_v55 = vpop.eup %4774 }
 0x32f   : > { %v1808_v57 = vmul.f32 %v4775_v55, %v4767_v33  ;;  %4440 = vmatmul.mubr.msk.bf16.vlgmr.msra.gmra.mrb[32].mxu1 %vm1570_vm2, %v1811_v40 }
 0x330   : > { %4450 = vmatpush3.bf16.msra.mxu1 %v1961_v56  ;;  %4451 = vmatprep.mubr.msk.bf16.mxu1 %vm4865_vm0, %v4864_v1 }
 0x331   : > { %v1812_v58 = vpack.c.bf16 %v1808_v57, %v1808_v57  ;;  %4461 = vmatprep.subr.bf16.mxu1 %v4864_v1 }
 0x332   : > { %v4777_v60 = vpop.eup %4776 }
 0x333   : > { %v1809_v61 = vmul.f32 %v4777_v60, %v4769_v35  ;;  %4446 = vmatmul.mubr.msk.bf16.vlgmr.msra.gmra.mrb[36].mxu0 %vm1570_vm2, %v1812_v58  ;;  %v4732_v60 = vld [vmem:[%s5732_s10] sm:$0xff]  }
 0x334   : > { %4456 = vmatpush3.bf16.msra.mxu0 %v2011_v59  ;;  %4457 = vmatprep.mubr.msk.bf16.mxu0 %vm4865_vm0, %v4864_v1 }
 0x335   : > { %v1813_v62 = vpack.c.bf16 %v1809_v61, %v1809_v61  ;;  %4467 = vmatprep.subr.bf16.mxu0 %v4864_v1  ;;  %v4734_v61 = vld [vmem:[%s5732_s10 + $0x8] sm:$0xff]  }
 0x337   : > { %4452 = vmatmul.mubr.msk.bf16.vlgmr.msra.gmra.mrb[36].mxu1 %vm1570_vm2, %v1813_v62  ;;  %v4735_v62 = vld [vmem:[%s5732_s10 + $0x18] sm:$0xff]  }
 0x338   : > { %4463 = vmatprep.mubr.msk.bf16.mxu1 %vm4865_vm0, %v4864_v1  ;;  %4462 = vmatpush3.bf16.msra.mxu1 %v2057_v0 }
 0x339   : > { %4473 = vmatprep.subr.bf16.mxu1 %v4864_v1 }
 0x3fe   : > { %v1859_v3 = vpop.f32.mrb[32].mxu0 }
 0x3ff   : > { %v2003_v4 = vpack.c.bf16 %v1859_v3, %v1859_v3  ;;  %v4435_v5 = vpop.f32.mrb[33].mxu0 }
 0x400   : > { %v1862_v8 = vpop.f32.mrb[34].mxu0 }
 0x401   : > { %v4436_v10 = vpop.f32.mrb[35].mxu0  ;;  %4458 = vmatmul.mubr.msk.bf16.vlgmr.msra.gmra.mrb[40].mxu0 %vm1570_vm2, %v2003_v4  ;;  %v4082_v4 = vld [vmem:[%s5783_s0] ss:$0 sm:$0xff] }
 0x402   : > { %v1905_v11 = vpop.f32.mrb[32].mxu1  ;;  %4468 = vmatpush3.bf16.msra.mxu0 %v2103_v6  ;;  %4469 = vmatprep.mubr.msk.bf16.mxu0 %vm4865_vm0, %v4864_v1  ;;  %v4083_v6 = vld [vmem:[%s5784_s9] ss:$0 sm:$0xff] }
 0x403   : > { %v2004_v12 = vpack.c.bf16 %v1905_v11, %v1905_v11  ;;  %v4441_v13 = vpop.f32.mrb[33].mxu1  ;;  %4479 = vmatprep.subr.bf16.mxu0 %v4864_v1  ;;  %v4736_v10 = vld [vmem:[%s5732_s10 + $0x20] sm:$0xff]   ;;  %v4737_v11 = vld [vmem:[%s5732_s10 + $0x30] sm:$0xff]  }
 0x404   : > { %v1908_v15 = vpop.f32.mrb[34].mxu1  ;;  %v4738_v13 = vld [vmem:[%s5732_s10 + $0x28] sm:$0xff]  }
 0x405   : > { %v4442_v16 = vpop.f32.mrb[35].mxu1  ;;  %4464 = vmatmul.mubr.msk.bf16.vlgmr.msra.gmra.mrb[40].mxu1 %vm1570_vm2, %v2004_v12  ;;  %v4740_v15 = vld [vmem:[%s5734_s12] sm:$0xff]  }
 0x406   : > { %v1951_v17 = vpop.f32.mrb[36].mxu0  ;;  %4474 = vmatpush3.bf16.msra.mxu1 %v2149_v14  ;;  %4475 = vmatprep.mubr.msk.bf16.mxu1 %vm4865_vm0, %v4864_v1  ;;  %v4739_v14 = vld [vmem:[%s5732_s10 + $0x38] sm:$0xff]   ;;  %v4741_v16 = vld [vmem:[%s5734_s12 + $0x10] sm:$0xff]  }
 0x407   : > { %v2005_v18 = vpack.c.bf16 %v1951_v17, %v1951_v17  ;;  %v4447_v19 = vpop.f32.mrb[37].mxu0  ;;  %4487 = vmatprep.subr.bf16.mxu1 %v4864_v1  ;;  %v4742_v17 = vld [vmem:[%s5734_s12 + $0x8] sm:$0xff]  }
 0x408   : > { %v1954_v20 = vpop.f32.mrb[38].mxu0  ;;  %v786_v19 = vld [vmem:[%s775_s5] sm:$0xf]  ;;  %s5787_s5 = sshll.u32 %s5062_s2, 1  ;;  %s4180_s2 = sshll.u32 %s5013_s6, 6 }
 0x409   : > { %v4448_v21 = vpop.f32.mrb[39].mxu0  ;;  %4470 = vmatmul.mubr.msk.bf16.vlgmr.msra.gmra.mrb[44].mxu0 %vm1570_vm2, %v2005_v18  ;;  %v4743_v18 = vld [vmem:[%s5734_s12 + $0x18] sm:$0xff]   ;;  %v4744_v20 = vld [vmem:[%s5734_s12 + $0x20] sm:$0xff]   ;;  %s783_s0 = scalar_lea.vmem %s5788_s4, %s5787_s5  ;;  %s3976_s5 = sshll.u32 %s765_s27, 2 }
 0x40a   : > { %v1997_v22 = vpop.f32.mrb[36].mxu1  ;;  %4483 = vmatprep.mubr.msk.bf16.mxu0 %vm4865_vm0, %v4864_v1  ;;  %4480 = vmatpush3.bf16.msra.mxu0 %v4732_v60  ;;  %v4745_v21 = vld [vmem:[%s5734_s12 + $0x30] sm:$0xff]   ;;  %s767_s1 = scalar_lea.vmem [#allocation2], %s3976_s5  ;;  %s5680_s9 = scalar_lea.hbm %s5746_s24, %s4180_s2 }
 0x40b   : > { %v2006_v23 = vpack.c.bf16 %v1997_v22, %v1997_v22  ;;  %v4453_v24 = vpop.f32.mrb[37].mxu1  ;;  %4481 = vmatprep.subr.bf16.mxu0 %v4864_v1  ;;  %v4746_v22 = vld [vmem:[%s5734_s12 + $0x28] sm:$0xff]   ;;  %s3877_s7 = sshll.u32 %s767_s1, 4  ;;  %s4866_s6 = smov [#allocation2]   ;;  %s5682_s7 = int_to_ptr.vmem [resolvable:$true] %s3877_s7 }
 0x40c   : > { %v2000_v25 = vpop.f32.mrb[38].mxu1  ;;  %v4748_v24 = vld [vmem:[%s5734_s12 + $0x40] sm:$0xff]   ;;  %s4800_s25 = scalar_lea.vmem %s5682_s7, 64  ;;  %s4804_s5 = sshll.u32 %s4866_s6, 4  ;;  %s4805_s5 = int_to_ptr.vmem [resolvable:$false] %s4804_s5 }
 0x40d   : > { %v4454_v26 = vpop.f32.mrb[39].mxu1  ;;  %4476 = vmatmul.mubr.msk.bf16.vlgmr.msra.gmra.mrb[44].mxu1 %vm1570_vm2, %v2006_v23  ;;  %v4747_v23 = vld [vmem:[%s5734_s12 + $0x38] sm:$0xff]   ;;  %v4749_v25 = vld [vmem:[%s5734_s12 + $0x50] sm:$0xff]   ;;  %p4801_p11 = scmp.ne.s32.totalorder %s5682_s7, %s4800_s25  ;;  %s4806_s4 = scalar_lea.vmem %s4805_s5, 128 }
 0x40e   : > { %4491 = vmatprep.mubr.msk.bf16.mxu1 %vm4865_vm0, %v4864_v1  ;;  %4488 = vmatpush3.bf16.msra.mxu1 %v4733_v7  ;;  %v4750_v26 = vld [vmem:[%s5734_s12 + $0x48] sm:$0xff]   ;;  %p4807_p0 = scmp.lt.s32.totalorder %s5682_s7, %s4805_s5  ;;  %p4808_p1 = scmp.lt.s32.totalorder %s4806_s4, %s4800_s25 }
 0x40f   : > { %4489 = vmatprep.subr.bf16.mxu1 %v4864_v1  ;;  %4482 = vmatpush3.bf16.msra.mxu0 %v4734_v61  ;;  %v4104_v61 = vld [vmem:[%s5733_s11] ss:$0 sm:$0xff]  ;;  %p4802_p12 = pnand %p4801_p11, %p5030_p5 }
 0x410   : > { %4495 = vmatprep.subr.bf16.mxu0 %v4864_v1  ;;  %p4809_p2 = por %p4808_p1, %p4807_p0 }
 0x411   : > { %p4803_p13 = pneg %p4802_p12 }
 0x412   : > { %4490 = vmatpush3.bf16.msra.mxu1 %v4735_v62  ;;  %v4105_v62 = vld [vmem:[%s5733_s11 + $0x1] ss:$0 sm:$0xff] }
 0x413   : > { %4503 = vmatprep.subr.bf16.mxu1 %v4864_v1  ;;  %p4810_p3 = pnand %p4809_p2, %p4803_p13 }
 0x4d4   : > { %v2047_v27 = vpop.f32.mrb[40].mxu0 }
 0x4d5   : > { %v4459_v28 = vpop.f32.mrb[41].mxu0  ;;  %v2191_v32 = vsel %vm898_vm1, %v2047_v27, 0.0  ;;  %v4751_v27 = vld [vmem:[%s5734_s12 + $0x58] sm:$0xff]  }
 0x4d6   : > { %v2050_v29 = vpop.f32.mrb[42].mxu0  ;;  %v4752_v28 = vld [vmem:[%s5734_s12 + $0x60] sm:$0xff]  }
 0x4d7   : > { %v4460_v30 = vpop.f32.mrb[43].mxu0  ;;  %v4753_v29 = vld [vmem:[%s5734_s12 + $0x70] sm:$0xff]  }
 0x4d8   : > { %v2093_v31 = vpop.f32.mrb[40].mxu1  ;;  %v4754_v30 = vld [vmem:[%s5734_s12 + $0x68] sm:$0xff]  }
 0x4d9   : > { %v2192_v33 = vsel %vm898_vm1, %v2093_v31, 0.0  ;;  %v4465_v34 = vpop.f32.mrb[41].mxu1  ;;  %v4755_v31 = vld [vmem:[%s5734_s12 + $0x78] sm:$0xff]  }
 0x4da   : > { %v2193_v35 = vadd.f32 %v2192_v33, %v2191_v32  ;;  %v2096_v36 = vpop.f32.mrb[42].mxu1 }
 0x4db   : > { %v4466_v37 = vpop.f32.mrb[43].mxu1 }
 0x4dc   : > { %v2139_v38 = vpop.f32.mrb[44].mxu0 }
 0x4dd   : > { %v2194_v39 = vsel %vm898_vm1, %v2139_v38, 0.0  ;;  %v4471_v42 = vpop.f32.mrb[45].mxu0 }
 0x4de   : > { %v2195_v43 = vadd.f32 %v2194_v39, %v2193_v35  ;;  %v2142_v44 = vpop.f32.mrb[46].mxu0 }
 0x4df   : > { %v4472_v45 = vpop.f32.mrb[47].mxu0 }
 0x4e0   : > { %v2185_v46 = vpop.f32.mrb[44].mxu1 }
 0x4e1   : > { %v2196_v47 = vsel %vm898_vm1, %v2185_v46, 0.0  ;;  %v4477_v49 = vpop.f32.mrb[45].mxu1 }
 0x4e2   : > { %v2197_v50 = vadd.f32 %v2196_v47, %v2195_v43  ;;  %v2188_v51 = vpop.f32.mrb[46].mxu1 }
 0x4e3   : > { %v4478_v53 = vpop.f32.mrb[47].mxu1  ;;  %v4121_v51 = vld [vmem:[%s5735_s13 + $0x1] ss:$0 sm:$0xff] }
 0x4e4   : > { %v2205_v54 = vadd.f32 %v4081_v48, %v2197_v50  ;;  %v4120_v50 = vld [vmem:[%s5735_s13] ss:$0 sm:$0xff] }
 0x4e6   : > { %v2206_v40 = vadd.f32 %v2205_v54, %v793_v52 }
 0x4e8   : > { %v2209_v55 = vsel %vm898_vm1, %v2206_v40, 0.0 }
 0x4e9   : > { %2210 = vadd.xlane.f32.xlu0 %v2209_v55 }
 0x576   : > { %v2211_v41 = vpop.xlane.xlu0 %2210 }
 0x577   : > { %v2213_v56 = vmul.f32 0.03125, %v2211_v41 }
 0x579   : > { %v2214_v57 = vsub.f32 %v2206_v40, %v2213_v56 }
 0x57b   : > { %v2215_v58 = vmul.f32 %v2214_v57, %v2214_v57 }
 0x57d   : > { %v2216_v59 = vsel %vm898_vm1, %v2215_v58, 0.0 }
 0x57e   : > { %2217 = vadd.xlane.f32.xlu1 %v2216_v59 }
 0x60b   : > { %v2218_v63 = vpop.xlane.xlu1 %2217 }
 0x60c   : > { %v2219_v0 = vmul.f32 0.03125, %v2218_v63 }
 0x60e   : > { %v2220_v2 = vadd.f32 1e-12, %v2219_v0 }
 0x610   : > { %4778 = vrsqrt.f32 %v2220_v2  ;;  %v4122_v2 = vld [vmem:[%s5735_s13 + $0x2] ss:$0 sm:$0xff] }
 0x61a   : > { %v4779_v3 = vpop.eup %4778 }
 0x61b   : > { %v2222_v5 = vmul.f32 %v4779_v3, %v2214_v57  ;;  %v4123_v3 = vld [vmem:[%s5735_s13 + $0x3] ss:$0 sm:$0xff] }
 0x61d   : > { %v2229_v8 = vmul.f32 %v4082_v4, %v2222_v5 }
 0x61f   : > { %v5366_v9 = vadd.f32 %v4083_v6, %v2229_v8 }
 0x621   : > { %v2237_v12 = vpack.c.bf16 %v5366_v9, %v5366_v9 }
 0x623   : > { %4484 = vmatmul.mubr.msk.bf16.vlgmr.msra.gmra.mrb[48].mxu0 %vm898_vm1, %v2237_v12  ;;  %4492 = vmatmul.mubr.msk.bf16.vlgmr.msra.gmra.mrb[48].mxu1 %vm898_vm1, %v2237_v12 }
 0x624   : > { %4496 = vmatpush3.bf16.msra.mxu0 %v4736_v10  ;;  %4504 = vmatpush3.bf16.msra.mxu1 %v4737_v11 }
 0x625   : > { %4497 = vmatprep.subr.bf16.mxu0 %v4864_v1  ;;  %4505 = vmatprep.subr.bf16.mxu1 %v4864_v1 }
 0x626   : > { %4499 = vmatprep.mubr.msk.bf16.mxu0 %vm4865_vm0, %v4864_v1  ;;  %4507 = vmatprep.mubr.msk.bf16.mxu1 %vm4865_vm0, %v4864_v1 }
 0x628   : > { %4498 = vmatpush3.bf16.msra.mxu0 %v4738_v13  ;;  %4506 = vmatpush3.bf16.msra.mxu1 %v4739_v14 }
 0x629   : > { %4511 = vmatprep.subr.bf16.mxu0 %v4864_v1  ;;  %4519 = vmatprep.subr.bf16.mxu1 %v4864_v1 }
 0x62b   : > { %4500 = vmatmul.mubr.msk.bf16.vlgmr.msra.gmra.mrb[52].mxu0 %vm898_vm1, %v2237_v12  ;;  %4508 = vmatmul.mubr.msk.bf16.vlgmr.msra.gmra.mrb[52].mxu1 %vm898_vm1, %v2237_v12 }
 0x62c   : > { %4512 = vmatpush3.bf16.msra.mxu0 %v4740_v15  ;;  %4520 = vmatpush3.bf16.msra.mxu1 %v4741_v16 }
 0x62d   : > { %4513 = vmatprep.subr.bf16.mxu0 %v4864_v1  ;;  %4521 = vmatprep.subr.bf16.mxu1 %v4864_v1 }
 0x62e   : > { %4515 = vmatprep.mubr.msk.bf16.mxu0 %vm4865_vm0, %v4864_v1  ;;  %4523 = vmatprep.mubr.msk.bf16.mxu1 %vm4865_vm0, %v4864_v1 }
 0x630   : > { %4514 = vmatpush3.bf16.msra.mxu0 %v4742_v17  ;;  %4522 = vmatpush3.bf16.msra.mxu1 %v4743_v18 }
 0x631   : > { %4527 = vmatprep.subr.bf16.mxu0 %v4864_v1  ;;  %4535 = vmatprep.subr.bf16.mxu1 %v4864_v1 }
 0x633   : > { %4516 = vmatmul.mubr.msk.bf16.vlgmr.msra.gmra.mrb[56].mxu0 %vm898_vm1, %v786_v19  ;;  %4524 = vmatmul.mubr.msk.bf16.vlgmr.msra.gmra.mrb[56].mxu1 %vm898_vm1, %v786_v19 }
 0x634   : > { %4528 = vmatpush3.bf16.msra.mxu0 %v4744_v20  ;;  %4536 = vmatpush3.bf16.msra.mxu1 %v4745_v21 }
 0x635   : > { %4529 = vmatprep.subr.bf16.mxu0 %v4864_v1  ;;  %4537 = vmatprep.subr.bf16.mxu1 %v4864_v1 }
 0x636   : > { %4531 = vmatprep.mubr.msk.bf16.mxu0 %vm4865_vm0, %v4864_v1  ;;  %4539 = vmatprep.mubr.msk.bf16.mxu1 %vm4865_vm0, %v4864_v1 }
 0x638   : > { %4530 = vmatpush3.bf16.msra.mxu0 %v4746_v22  ;;  %4538 = vmatpush3.bf16.msra.mxu1 %v4747_v23  ;;  %v4106_v22 = vld [vmem:[%s5733_s11 + $0x2] ss:$0 sm:$0xff]  ;;  %v4107_v23 = vld [vmem:[%s5733_s11 + $0x3] ss:$0 sm:$0xff] }
 0x639   : > { %4543 = vmatprep.subr.bf16.mxu0 %v4864_v1  ;;  %4551 = vmatprep.subr.bf16.mxu1 %v4864_v1 }
 0x63b   : > { %4532 = vmatmul.mubr.msk.bf16.vlgmr.msra.gmra.mrb[60].mxu0 %vm898_vm1, %v786_v19  ;;  %4540 = vmatmul.mubr.msk.bf16.vlgmr.msra.gmra.mrb[60].mxu1 %vm898_vm1, %v786_v19 }
 0x63c   : > { %4544 = vmatpush3.bf16.msra.mxu0 %v4748_v24  ;;  %4547 = vmatprep.mubr.msk.bf16.mxu0 %vm4865_vm0, %v4864_v1 }
 0x63d   : > { %4545 = vmatprep.subr.bf16.mxu0 %v4864_v1  ;;  %4555 = vmatprep.mubr.msk.bf16.mxu1 %vm4865_vm0, %v4864_v1 }
 0x63e   : > { %4552 = vmatpush3.bf16.msra.mxu1 %v4749_v25 }
 0x63f   : > { %4553 = vmatprep.subr.bf16.mxu1 %v4864_v1 }
 0x640   : > { %4546 = vmatpush3.bf16.msra.mxu0 %v4750_v26 }
 0x641   : > { %4559 = vmatprep.subr.bf16.mxu0 %v4864_v1 }
 0x642   : > { %4554 = vmatpush3.bf16.msra.mxu1 %v4751_v27 }
 0x643   : > { %4548 = vmatmul.mubr.msk.bf16.vlgmr.msra.gmra.mrb[64].mxu0 %vm898_vm1, %v786_v19  ;;  %4567 = vmatprep.subr.bf16.mxu1 %v4864_v1 }
 0x644   : > { %4563 = vmatprep.mubr.msk.bf16.mxu0 %vm4865_vm0, %v4864_v1  ;;  %4560 = vmatpush3.bf16.msra.mxu0 %v4752_v28 }
 0x645   : > { %4556 = vmatmul.mubr.msk.bf16.vlgmr.msra.gmra.mrb[64].mxu1 %vm898_vm1, %v786_v19  ;;  %4561 = vmatprep.subr.bf16.mxu0 %v4864_v1 }
 0x646   : > { %4568 = vmatpush3.bf16.msra.mxu1 %v4753_v29  ;;  %4571 = vmatprep.mubr.msk.bf16.mxu1 %vm4865_vm0, %v4864_v1 }
 0x647   : > { %4569 = vmatprep.subr.bf16.mxu1 %v4864_v1 }
 0x648   : > { %4562 = vmatpush3.bf16.msra.mxu0 %v4754_v30  ;;  %v4136_v30 = vld [vmem:[%s5735_s13 + $0x4] ss:$0 sm:$0xff] }
 0x649   : > { %4575 = vmatprep.subr.bf16.mxu0 %v4864_v1 }
 0x64a   : > { %4570 = vmatpush3.bf16.msra.mxu1 %v4755_v31 }
 0x64b   : > { %4581 = vmatprep.subr.bf16.mxu1 %v4864_v1  ;;  %4564 = vmatmul.mubr.msk.bf16.vlgmr.msra.gmra.mrb[68].mxu0 %vm898_vm1, %v786_v19 }
 0x64c   : > { %4577 = vmatprep.mubr.msk.bf16.mxu0 %vm4865_vm0, %v4864_v1 }
 0x64d   : > { %4572 = vmatmul.mubr.msk.bf16.vlgmr.msra.gmra.mrb[68].mxu1 %vm898_vm1, %v786_v19 }
 0x64e   : > { %4583 = vmatprep.mubr.msk.bf16.mxu1 %vm4865_vm0, %v4864_v1 }
 0x6f6   : > { %v2377_v32 = vpop.f32.mrb[48].mxu0  ;;  %v2429_v33 = vpop.f32.mrb[48].mxu1 }
 0x6f7   : > { %v4485_v34 = vpop.f32.mrb[49].mxu0  ;;  %v4493_v35 = vpop.f32.mrb[49].mxu1  ;;  %v2378_v4 = vadd.f32 %v4104_v61, %v2377_v32  ;;  %v2430_v5 = vadd.f32 %v4105_v62, %v2429_v33  ;;  %v4137_v32 = vld [vmem:[%s5735_s13 + $0x5] ss:$0 sm:$0xff] }
 0x6f8   : > { %v2380_v36 = vpop.f32.mrb[50].mxu0  ;;  %v2432_v37 = vpop.f32.mrb[50].mxu1 }
 0x6f9   : > { %v4486_v38 = vpop.f32.mrb[51].mxu0  ;;  %v4494_v39 = vpop.f32.mrb[51].mxu1  ;;  %v3006_v16 = vpack.c.bf16 %v2378_v4, %v2378_v4  ;;  %v3007_v17 = vpack.c.bf16 %v2430_v5, %v2430_v5 }
 0x6fe   : > { %v2481_v42 = vpop.f32.mrb[52].mxu0  ;;  %v2533_v43 = vpop.f32.mrb[52].mxu1 }
 0x6ff   : > { %v4501_v44 = vpop.f32.mrb[53].mxu0  ;;  %v4509_v45 = vpop.f32.mrb[53].mxu1  ;;  %v2482_v26 = vadd.f32 %v4106_v22, %v2481_v42  ;;  %v2534_v27 = vadd.f32 %v4107_v23, %v2533_v43 }
 0x700   : > { %v2484_v46 = vpop.f32.mrb[54].mxu0  ;;  %v2536_v47 = vpop.f32.mrb[54].mxu1 }
 0x701   : > { %v4502_v48 = vpop.f32.mrb[55].mxu0  ;;  %v4510_v49 = vpop.f32.mrb[55].mxu1  ;;  %v3008_v28 = vpack.c.bf16 %v2482_v26, %v2482_v26  ;;  %v3009_v29 = vpack.c.bf16 %v2534_v27, %v2534_v27 }
 0x706   : > { %v2612_v52 = vpop.f32.mrb[56].mxu0  ;;  %v2664_v53 = vpop.f32.mrb[56].mxu1 }
 0x707   : > { %v2613_v54 = vadd.f32 %v4120_v50, %v2612_v52  ;;  %v2665_v40 = vadd.f32 %v4121_v51, %v2664_v53  ;;  %v4517_v55 = vpop.f32.mrb[57].mxu0  ;;  %v4525_v41 = vpop.f32.mrb[57].mxu1 }
 0x708   : > { %v2615_v56 = vpop.f32.mrb[58].mxu0  ;;  %v2667_v57 = vpop.f32.mrb[58].mxu1  ;;  %v790_v55 = vld [vmem:[%s783_s0] sm:$0x3] }
 0x709   : > { %v3010_v58 = vpack.c.bf16 %v2613_v54, %v2613_v54  ;;  %v3011_v59 = vpack.c.bf16 %v2665_v40, %v2665_v40  ;;  %v4518_v60 = vpop.f32.mrb[59].mxu0  ;;  %v4526_v7 = vpop.f32.mrb[59].mxu1  ;;  %v791_v41 = vunpack.c.0.s8 %v790_v55 }
 0x70b   : > { %v3018_v63 = vsel %vm1570_vm2, %v3010_v58, 0  ;;  %v3064_v0 = vsel %vm1570_vm2, %v3011_v59, 0  ;;  %v792_v56 = vcvt.s32.f32 %v791_v41 }
 0x70c   : > { %4576 = vmatpush3.bf16.xpose.msra.mxu0 %v3018_v63  ;;  %4582 = vmatpush3.bf16.xpose.msra.mxu1 %v3064_v0 }
 0x70d   : > { %4587 = vmatprep.subr.bf16.mxu0 %v4864_v1  ;;  %4593 = vmatprep.subr.bf16.mxu1 %v4864_v1  ;;  %vm3202_vm5 = vcmp.eq.f32.partialorder %v792_v56, 0.0 }
 0x70e   : > { %v2716_v6 = vpop.f32.mrb[60].mxu0  ;;  %v2768_v8 = vpop.f32.mrb[60].mxu1 }
 0x70f   : > { %v2717_v10 = vadd.f32 %v4122_v2, %v2716_v6  ;;  %v2769_v11 = vadd.f32 %v4123_v3, %v2768_v8  ;;  %v4533_v12 = vpop.f32.mrb[61].mxu0  ;;  %v4541_v13 = vpop.f32.mrb[61].mxu1 }
 0x710   : > { %v2719_v14 = vpop.f32.mrb[62].mxu0  ;;  %v2771_v15 = vpop.f32.mrb[62].mxu1 }
 0x711   : > { %v3012_v18 = vpack.c.bf16 %v2717_v10, %v2717_v10  ;;  %v3013_v19 = vpack.c.bf16 %v2769_v11, %v2769_v11  ;;  %v4534_v20 = vpop.f32.mrb[63].mxu0  ;;  %v4542_v21 = vpop.f32.mrb[63].mxu1 }
 0x713   : > { %v3110_v24 = vsel %vm1570_vm2, %v3012_v18, 0  ;;  %v3156_v25 = vsel %vm1570_vm2, %v3013_v19, 0  ;;  %4578 = vmatmul.mubr.msk.bf16.vlgmr.msra.gmra.mrb[72].mxu0 %vm1570_vm2, %v3006_v16  ;;  %4584 = vmatmul.mubr.msk.bf16.vlgmr.msra.gmra.mrb[72].mxu1 %vm1570_vm2, %v3007_v17 }
 0x714   : > { %4588 = vmatpush3.bf16.xpose.msra.mxu0 %v3110_v24  ;;  %4594 = vmatpush3.bf16.xpose.msra.mxu1 %v3156_v25 }
 0x715   : > { %4589 = vmatprep.mubr.msk.bf16.mxu0 %vm4865_vm0, %v4864_v1  ;;  %4595 = vmatprep.mubr.msk.bf16.mxu1 %vm4865_vm0, %v4864_v1 }
 0x716   : > { %4599 = vmatprep.subr.bf16.mxu0 %v4864_v1  ;;  %4605 = vmatprep.subr.bf16.mxu1 %v4864_v1  ;;  %v2844_v31 = vpop.f32.mrb[64].mxu0 }
 0x717   : > { %v2845_v33 = vadd.f32 %v4136_v30, %v2844_v31  ;;  %v4549_v34 = vpop.f32.mrb[65].mxu0 }
 0x718   : > { %v2847_v35 = vpop.f32.mrb[66].mxu0  ;;  %v2896_v36 = vpop.f32.mrb[64].mxu1 }
 0x719   : > { %v3257_v37 = vpack.c.bf16 %v2845_v33, %v2845_v33  ;;  %v2897_v38 = vadd.f32 %v4137_v32, %v2896_v36  ;;  %v4550_v39 = vpop.f32.mrb[67].mxu0  ;;  %v4557_v42 = vpop.f32.mrb[65].mxu1 }
 0x71a   : > { %v2899_v43 = vpop.f32.mrb[66].mxu1 }
 0x71b   : > { %4590 = vmatmul.mubr.msk.bf16.vlgmr.msra.gmra.mrb[76].mxu0 %vm1570_vm2, %v3008_v28  ;;  %4596 = vmatmul.mubr.msk.bf16.vlgmr.msra.gmra.mrb[76].mxu1 %vm1570_vm2, %v3009_v29  ;;  %v3265_v44 = vsel %vm1821_vm3, %v3257_v37, 0  ;;  %v3258_v45 = vpack.c.bf16 %v2897_v38, %v2897_v38  ;;  %v4558_v46 = vpop.f32.mrb[67].mxu1 }
 0x71c   : > { %4601 = vmatprep.mubr.msk.bf16.mxu0 %vm4865_vm0, %v4864_v1  ;;  %4607 = vmatprep.mubr.msk.bf16.mxu1 %vm4865_vm0, %v4864_v1 }
 0x71d   : > { %4600 = vmatpush3.bf16.msra.mxu0 %v3265_v44  ;;  %v3311_v47 = vsel %vm1821_vm3, %v3258_v45, 0 }
 0x71e   : > { %4611 = vmatprep.subr.bf16.mxu0 %v4864_v1  ;;  %4606 = vmatpush3.bf16.msra.mxu1 %v3311_v47  ;;  %v5545_v48 = vpop.f32.mrb[68].mxu0  ;;  %v4139_v47 = vld [vmem:[%s5735_s13 + $0x7] ss:$0 sm:$0xff] }
 0x71f   : > { %4617 = vmatprep.subr.bf16.mxu1 %v4864_v1  ;;  %v4565_v50 = vpop.f32.mrb[69].mxu0 }
 0x720   : > { %v5547_v49 = vpop.f32.mrb[68].mxu1  ;;  %v2951_v52 = vpop.f32.mrb[70].mxu0  ;;  %v4138_v50 = vld [vmem:[%s5735_s13 + $0x6] ss:$0 sm:$0xff] }
 0x721   : > { %v4573_v51 = vpop.f32.mrb[69].mxu1  ;;  %v4566_v54 = vpop.f32.mrb[71].mxu0 }
 0x722   : > { %v3003_v53 = vpop.f32.mrb[70].mxu1  ;;  %v3001_v51 = vadd.f32 %v4139_v47, %v5547_v49 }
 0x723   : > { %v4574_v40 = vpop.f32.mrb[71].mxu1  ;;  %v2949_v53 = vadd.f32 %v4138_v50, %v5545_v48 }
 0x724   : > { %v3260_v41 = vpack.c.bf16 %v3001_v51, %v3001_v51 }
 0x7e6   : > { %v3054_v57 = vpop.f32.mrb[72].mxu0  ;;  %v3100_v58 = vpop.f32.mrb[72].mxu1 }
 0x7e7   : > { %v3198_v59 = vmul.f32 0.35355338, %v3054_v57  ;;  %v3199_v60 = vmul.f32 0.35355338, %v3100_v58  ;;  %v4579_v7 = vpop.f32.mrb[73].mxu0  ;;  %v4585_v61 = vpop.f32.mrb[73].mxu1  ;;  %v3259_v57 = vpack.c.bf16 %v2949_v53, %v2949_v53 }
 0x7e8   : > { %v3057_v62 = vpop.f32.mrb[74].mxu0  ;;  %v3103_v63 = vpop.f32.mrb[74].mxu1  ;;  %v3403_v7 = vsel %vm1821_vm3, %v3260_v41, 0  ;;  %v2301_v61 = vld [vmem:[%s5736_s14 + $0x4] sm:$0xf] }
 0x7e9   : > { %v4580_v0 = vpop.f32.mrb[75].mxu0  ;;  %v4586_v2 = vpop.f32.mrb[75].mxu1  ;;  %v3206_v3 = vsel %vm3202_vm5, -10000.0, %v3199_v60  ;;  %v3205_v4 = vsel %vm3202_vm5, -10000.0, %v3198_v59  ;;  %v3357_v49 = vsel %vm1821_vm3, %v3259_v57, 0 }
 0x7ea   : > { %v3212_v5 = vsel %vm1570_vm2, %v3206_v3, -inf  ;;  %v3209_v6 = vsel %vm1570_vm2, %v3205_v4, -inf  ;;  %v2300_v0 = vld [vmem:[%s5736_s14] sm:$0xf] }
 0x7eb   : > { %3213 = vmax.xlane.f32.xlu1 %v3212_v5  ;;  %3210 = vmax.xlane.f32.xlu0 %v3209_v6  ;;  %v3453_v6 = vsel %vm1821_vm3, %v2300_v0, 0  ;;  %v4756_v0 = vld [vmem:[%s5740_s18] sm:$0xff]  }
 0x7ee   : > { %v3146_v8 = vpop.f32.mrb[76].mxu0  ;;  %v3192_v10 = vpop.f32.mrb[76].mxu1 }
 0x7ef   : > { %v3200_v11 = vmul.f32 0.35355338, %v3146_v8  ;;  %v3201_v12 = vmul.f32 0.35355338, %v3192_v10  ;;  %v4591_v13 = vpop.f32.mrb[77].mxu0  ;;  %v4597_v14 = vpop.f32.mrb[77].mxu1 }
 0x7f0   : > { %v3149_v15 = vpop.f32.mrb[78].mxu0  ;;  %v3195_v16 = vpop.f32.mrb[78].mxu1  ;;  %v2303_v8 = vld [vmem:[%s5736_s14 + $0xc] sm:$0xf]  ;;  %v2302_v10 = vld [vmem:[%s5736_s14 + $0x8] sm:$0xf] }
 0x7f1   : > { %v4592_v17 = vpop.f32.mrb[79].mxu0  ;;  %v4598_v18 = vpop.f32.mrb[79].mxu1  ;;  %v3208_v19 = vsel %vm3202_vm5, -10000.0, %v3201_v12  ;;  %v3207_v20 = vsel %vm3202_vm5, -10000.0, %v3200_v11  ;;  %v3591_v15 = vsel %vm1821_vm3, %v2303_v8, 0 }
 0x7f2   : > { %v3218_v21 = vsel %vm1570_vm2, %v3208_v19, -inf  ;;  %v3215_v22 = vsel %vm1570_vm2, %v3207_v20, -inf }
 0x7f3   : > { %3219 = vmax.xlane.f32.xlu1 %v3218_v21  ;;  %3216 = vmax.xlane.f32.xlu0 %v3215_v22 }
 0x878   : > { %v3214_v23 = vpop.xlane.xlu1 %3213  ;;  %v3211_v24 = vpop.xlane.xlu0 %3210 }
 0x879   : > { %v3222_v25 = vsub.f32 %v3206_v3, %v3214_v23  ;;  %v3221_v26 = vsub.f32 %v3205_v4, %v3211_v24  ;;  %v3499_v4 = vsel %vm1821_vm3, %v2301_v61, 0 }
 0x87b   : > { %v3227_v27 = vmul.f32 1.442695, %v3222_v25  ;;  %v3225_v28 = vmul.f32 1.442695, %v3221_v26 }
 0x87d   : > { %4780 = vpow2.f32 %v3227_v27 }
 0x87e   : > { %4782 = vpow2.f32 %v3225_v28 }
 0x880   : > { %v3220_v29 = vpop.xlane.xlu1 %3219  ;;  %v3217_v30 = vpop.xlane.xlu0 %3216 }
 0x881   : > { %v3224_v31 = vsub.f32 %v3208_v19, %v3220_v29  ;;  %v3223_v32 = vsub.f32 %v3207_v20, %v3217_v30  ;;  %v3545_v19 = vsel %vm1821_vm3, %v2302_v10, 0  ;;  %v4165_v10 = vld [vmem:[%s5738_s16] ss:$0 sm:$0xff] }
 0x883   : > { %v3231_v33 = vmul.f32 1.442695, %v3224_v31  ;;  %v3229_v34 = vmul.f32 1.442695, %v3223_v32 }
 0x885   : > { %4784 = vpow2.f32 %v3231_v33 }
 0x886   : > { %4786 = vpow2.f32 %v3229_v34 }
 0x887   : > { %v4781_v35 = vpop.eup %4780 }
 0x888   : > { %v4783_v36 = vpop.eup %4782  ;;  %v3236_v37 = vsel %vm1570_vm2, %v4781_v35, 0.0 }
 0x889   : > { %3237 = vadd.xlane.f32.xlu1 %v3236_v37  ;;  %v3233_v38 = vsel %vm1570_vm2, %v4783_v36, 0.0 }
 0x88a   : > { %3234 = vadd.xlane.f32.xlu0 %v3233_v38 }
 0x88f   : > { %v4785_v39 = vpop.eup %4784 }
 0x890   : > { %v4787_v42 = vpop.eup %4786  ;;  %v3242_v43 = vsel %vm1570_vm2, %v4785_v39, 0.0 }
 0x891   : > { %3243 = vadd.xlane.f32.xlu1 %v3242_v43  ;;  %v3239_v44 = vsel %vm1570_vm2, %v4787_v42, 0.0 }
 0x892   : > { %3240 = vadd.xlane.f32.xlu0 %v3239_v44 }
 0x916   : > { %v3238_v45 = vpop.xlane.xlu1 %3237 }
 0x917   : > { %4788 = vrcp.f32 %v3238_v45  ;;  %v3235_v46 = vpop.xlane.xlu0 %3234 }
 0x918   : > { %4790 = vrcp.f32 %v3235_v46 }
 0x91e   : > { %v3244_v52 = vpop.xlane.xlu1 %3243 }
 0x91f   : > { %4792 = vrcp.f32 %v3244_v52  ;;  %v3241_v54 = vpop.xlane.xlu0 %3240 }
 0x920   : > { %4794 = vrcp.f32 %v3241_v54 }
 0x921   : > { %v4789_v40 = vpop.eup %4788 }
 0x922   : > { %v4791_v55 = vpop.eup %4790  ;;  %v3250_v56 = vmul.f32 %v4789_v40, %v4781_v35 }
 0x923   : > { %v3249_v58 = vmul.f32 %v4791_v55, %v4783_v36 }
 0x924   : > { %v3254_v59 = vpack.c.bf16 %v3250_v56, %v3250_v56  ;;  %v4164_v56 = vld [vmem:[%s5737_s15] ss:$0 sm:$0xff] }
 0x925   : > { %v3253_v60 = vpack.c.bf16 %v3249_v58, %v3249_v58 }
 0x926   : > { %4608 = vmatmul.mubr.msk.bf16.vlgmr.msra.gmra.mrb[80].mxu1 %vm1570_vm2, %v3254_v59 }
 0x927   : > { %4602 = vmatmul.mubr.msk.bf16.vlgmr.msra.gmra.mrb[80].mxu0 %vm1570_vm2, %v3253_v60  ;;  %4618 = vmatpush3.bf16.msra.mxu1 %v3403_v7 }
 0x928   : > { %4612 = vmatpush3.bf16.msra.mxu0 %v3357_v49  ;;  %4613 = vmatprep.mubr.msk.bf16.mxu0 %vm4865_vm0, %v4864_v1 }
 0x929   : > { %v4793_v48 = vpop.eup %4792  ;;  %4619 = vmatprep.mubr.msk.bf16.mxu1 %vm4865_vm0, %v4864_v1  ;;  %4623 = vmatprep.subr.bf16.mxu0 %v4864_v1 }
 0x92a   : > { %v4795_v62 = vpop.eup %4794  ;;  %v3252_v63 = vmul.f32 %v4793_v48, %v4785_v39  ;;  %4629 = vmatprep.subr.bf16.mxu1 %v4864_v1 }
 0x92b   : > { %v3251_v2 = vmul.f32 %v4795_v62, %v4787_v42 }
 0x92c   : > { %v3256_v3 = vpack.c.bf16 %v3252_v63, %v3252_v63 }
 0x92d   : > { %v3255_v5 = vpack.c.bf16 %v3251_v2, %v3251_v2  ;;  %v4757_v2 = vld [vmem:[%s5740_s18 + $0x8] sm:$0xff]  }
 0x92e   : > { %4620 = vmatmul.mubr.msk.bf16.vlgmr.msra.gmra.mrb[84].mxu1 %vm1570_vm2, %v3256_v3  ;;  %v4759_v3 = vld [vmem:[%s5742_s20 + $0x8] sm:$0xff]  }
 0x92f   : > { %4614 = vmatmul.mubr.msk.bf16.vlgmr.msra.gmra.mrb[84].mxu0 %vm1570_vm2, %v3255_v5  ;;  %4630 = vmatpush3.bf16.msra.mxu1 %v3499_v4 }
 0x930   : > { %4624 = vmatpush3.bf16.msra.mxu0 %v3453_v6  ;;  %4625 = vmatprep.mubr.msk.bf16.mxu0 %vm4865_vm0, %v4864_v1 }
 0x931   : > { %4631 = vmatprep.mubr.msk.bf16.mxu1 %vm4865_vm0, %v4864_v1  ;;  %4635 = vmatprep.subr.bf16.mxu0 %v4864_v1 }
 0x932   : > { %4641 = vmatprep.subr.bf16.mxu1 %v4864_v1 }
 0x9f9   : > { %v3347_v11 = vpop.f32.mrb[80].mxu1 }
 0x9fa   : > { %v3301_v12 = vpop.f32.mrb[80].mxu0  ;;  %v3446_v13 = vpack.c.bf16 %v3347_v11, %v3347_v11  ;;  %v4609_v14 = vpop.f32.mrb[81].mxu1 }
 0x9fb   : > { %v3445_v16 = vpack.c.bf16 %v3301_v12, %v3301_v12  ;;  %v4603_v17 = vpop.f32.mrb[81].mxu0  ;;  %v3350_v18 = vpop.f32.mrb[82].mxu1  ;;  %v4166_v12 = vld [vmem:[%s5739_s17] ss:$0 sm:$0xff] }
 0x9fc   : > { %v3304_v20 = vpop.f32.mrb[82].mxu0  ;;  %v4610_v21 = vpop.f32.mrb[83].mxu1  ;;  %4632 = vmatmul.mubr.msk.bf16.vlgmr.msra.gmra.mrb[88].mxu1 %vm1570_vm2, %v3446_v13  ;;  %v4761_v17 = vld [vmem:[%s5742_s20 + $0x18] sm:$0xff]   ;;  %v4167_v18 = vld [vmem:[%s5741_s19] ss:$0 sm:$0xff] }
 0x9fd   : > { %v4604_v22 = vpop.f32.mrb[83].mxu0  ;;  %4626 = vmatmul.mubr.msk.bf16.vlgmr.msra.gmra.mrb[88].mxu0 %vm1570_vm2, %v3445_v16  ;;  %4642 = vmatpush3.bf16.msra.mxu1 %v3591_v15  ;;  %v4760_v16 = vld [vmem:[%s5742_s20 + $0x10] sm:$0xff]  }
 0x9fe   : > { %4636 = vmatpush3.bf16.msra.mxu0 %v3545_v19  ;;  %4637 = vmatprep.mubr.msk.bf16.mxu0 %vm4865_vm0, %v4864_v1 }
 0x9ff   : > { %4643 = vmatprep.mubr.msk.bf16.mxu1 %vm4865_vm0, %v4864_v1  ;;  %4647 = vmatprep.subr.bf16.mxu0 %v4864_v1 }
 0xa00   : > { %4655 = vmatprep.subr.bf16.mxu1 %v4864_v1 }
 0xa01   : > { %v3439_v23 = vpop.f32.mrb[84].mxu1 }
 0xa02   : > { %v3393_v24 = vpop.f32.mrb[84].mxu0  ;;  %v3448_v25 = vpack.c.bf16 %v3439_v23, %v3439_v23  ;;  %v4621_v26 = vpop.f32.mrb[85].mxu1 }
 0xa03   : > { %v3447_v27 = vpack.c.bf16 %v3393_v24, %v3393_v24  ;;  %v4615_v28 = vpop.f32.mrb[85].mxu0  ;;  %v3442_v29 = vpop.f32.mrb[86].mxu1 }
 0xa04   : > { %v3396_v30 = vpop.f32.mrb[86].mxu0  ;;  %v4622_v31 = vpop.f32.mrb[87].mxu1  ;;  %4644 = vmatmul.mubr.msk.bf16.vlgmr.msra.gmra.mrb[92].mxu1 %vm1570_vm2, %v3448_v25 }
 0xa05   : > { %v4616_v32 = vpop.f32.mrb[87].mxu0  ;;  %4638 = vmatmul.mubr.msk.bf16.vlgmr.msra.gmra.mrb[92].mxu0 %vm1570_vm2, %v3447_v27  ;;  %4663 = vmatprep.mubr.msk.bf16.mxu1 %vm4865_vm0, %v4864_v1 }
 0xa06   : > { %4651 = vmatprep.mubr.msk.bf16.mxu0 %vm4865_vm0, %v4864_v1  ;;  %4648 = vmatpush3.bf16.msra.mxu0 %v4756_v0 }
 0xa07   : > { %4649 = vmatprep.subr.bf16.mxu0 %v4864_v1 }
 0xa0a   : > { %4650 = vmatpush3.bf16.msra.mxu0 %v4757_v2 }
 0xacf   : > { %v3535_v33 = vpop.f32.mrb[88].mxu1 }
 0xad0   : > { %v3489_v34 = vpop.f32.mrb[88].mxu0  ;;  %v3634_v35 = vsel %vm898_vm1, %v3535_v33, 0.0  ;;  %v4633_v36 = vpop.f32.mrb[89].mxu1 }
 0xad1   : > { %v3633_v37 = vsel %vm898_vm1, %v3489_v34, 0.0  ;;  %v4627_v38 = vpop.f32.mrb[89].mxu0  ;;  %v3538_v39 = vpop.f32.mrb[90].mxu1 }
 0xad2   : > { %v3635_v42 = vadd.f32 %v3634_v35, %v3633_v37  ;;  %v3492_v43 = vpop.f32.mrb[90].mxu0  ;;  %v4634_v44 = vpop.f32.mrb[91].mxu1 }
 0xad3   : > { %v4628_v45 = vpop.f32.mrb[91].mxu0  ;;  %v4177_v44 = vld [vmem:[%s5744_s22] ss:$0 sm:$0xff] }
 0xad7   : > { %v3627_v46 = vpop.f32.mrb[92].mxu1 }
 0xad8   : > { %v3581_v47 = vpop.f32.mrb[92].mxu0  ;;  %v4645_v50 = vpop.f32.mrb[93].mxu1  ;;  %v3638_v41 = vsel %vm898_vm1, %v3627_v46, 0.0  ;;  %v4178_v46 = vld [vmem:[%s5745_s23] ss:$0 sm:$0xff] }
 0xad9   : > { %v3636_v51 = vsel %vm898_vm1, %v3581_v47, 0.0  ;;  %v4639_v52 = vpop.f32.mrb[93].mxu0  ;;  %v3630_v53 = vpop.f32.mrb[94].mxu1 }
 0xada   : > { %v3637_v54 = vadd.f32 %v3636_v51, %v3635_v42  ;;  %v3584_v40 = vpop.f32.mrb[94].mxu0  ;;  %v4646_v55 = vpop.f32.mrb[95].mxu1 }
 0xadb   : > { %v4640_v57 = vpop.f32.mrb[95].mxu0 }
 0xadc   : > { %v3639_v58 = vadd.f32 %v3638_v41, %v3637_v54 }
 0xade   : > { %v3647_v59 = vadd.f32 %v4164_v56, %v3639_v58 }
 0xae0   : > { %v3648_v60 = vadd.f32 %v3647_v59, %v5366_v9  ;;  %v4758_v9 = vld [vmem:[%s5742_s20] sm:$0xff]  }
 0xae1   : > { %4656 = vmatpush3.bf16.msra.mxu1 %v4758_v9 }
 0xae2   : > { %v3651_v7 = vsel %vm898_vm1, %v3648_v60, 0.0  ;;  %4657 = vmatprep.subr.bf16.mxu1 %v4864_v1 }
 0xae3   : > { %3652 = vadd.xlane.f32.xlu0 %v3651_v7 }
 0xae5   : > { %4658 = vmatpush3.bf16.msra.mxu1 %v4759_v3 }
 0xae6   : > { %4659 = vmatprep.subr.bf16.mxu1 %v4864_v1 }
 0xae9   : > { %4660 = vmatpush3.bf16.msra.mxu1 %v4760_v16 }
 0xaea   : > { %4661 = vmatprep.subr.bf16.mxu1 %v4864_v1  ;;  %v4171_v1 = vld [vmem:[%s5743_s21] ss:$0 sm:$0xff] }
 0xaed   : > { %4662 = vmatpush3.bf16.msra.mxu1 %v4761_v17 }
 0xb70   : > { %v3653_v49 = vpop.xlane.xlu0 %3652 }
 0xb71   : > { %v3654_v48 = vmul.f32 0.03125, %v3653_v49 }
 0xb73   : > { %v3655_v61 = vsub.f32 %v3648_v60, %v3654_v48 }
 0xb75   : > { %v3656_v62 = vmul.f32 %v3655_v61, %v3655_v61 }
 0xb77   : > { %v3657_v63 = vsel %vm898_vm1, %v3656_v62, 0.0 }
 0xb78   : > { %3658 = vadd.xlane.f32.xlu1 %v3657_v63 }
 0xc05   : > { %v3659_v4 = vpop.xlane.xlu1 %3658 }
 0xc06   : > { %v3660_v5 = vmul.f32 0.03125, %v3659_v4 }
 0xc08   : > { %v3661_v6 = vadd.f32 1e-12, %v3660_v5 }
 0xc0a   : > { %4796 = vrsqrt.f32 %v3661_v6 }
 0xc14   : > { %v4797_v8 = vpop.eup %4796 }
 0xc15   : > { %v3663_v11 = vmul.f32 %v4797_v8, %v3655_v61 }
 0xc17   : > { %v3670_v13 = vmul.f32 %v4165_v10, %v3663_v11 }
 0xc19   : > { %v3677_v14 = vadd.f32 %v4166_v12, %v3670_v13 }
 0xc1b   : > { %v3678_v15 = vpack.c.bf16 %v3677_v14, %v3677_v14 }
 0xc1d   : > { %4652 = vmatmul.mubr.msk.bf16.vlgmr.msra.gmra.mrb[96].mxu0 %vm898_vm1, %v3678_v15 }
 0xcf0   : > { %v3739_v19 = vpop.f32.mrb[96].mxu0 }
 0xcf1   : > { %v3740_v20 = vadd.f32 %v4167_v18, %v3739_v19  ;;  %v4653_v21 = vpop.f32.mrb[97].mxu0 }
 0xcf2   : > { %v3742_v22 = vpop.f32.mrb[98].mxu0 }
 0xcf3   : > { %v3745_v23 = vmax.f32 %v3740_v20, 0.0  ;;  %v4654_v24 = vpop.f32.mrb[99].mxu0 }
 0xcf5   : > { %v3746_v25 = vpack.c.bf16 %v3745_v23, %v3745_v23 }
 0xcf7   : > { %4664 = vmatmul.mubr.msk.bf16.vlgmr.msra.gmra.mrb[96].mxu1 %vm3786_vm6, %v3746_v25 }
 0xdca   : > { %v3824_v26 = vpop.f32.mrb[96].mxu1 }
 0xdcb   : > { %v3825_v27 = vadd.f32 %v4171_v1, %v3824_v26  ;;  %v4665_v28 = vpop.f32.mrb[97].mxu1 }
 0xdcc   : > { %v3827_v29 = vpop.f32.mrb[98].mxu1 }
 0xdcd   : > { %v4666_v30 = vpop.f32.mrb[99].mxu1  ;;  %v3830_v31 = vadd.f32 %v3825_v27, %v3677_v14 }
 0xdcf   : > { %v3833_v32 = vsel %vm898_vm1, %v3830_v31, 0.0 }
 0xdd0   : > { %3834 = vadd.xlane.f32.xlu0 %v3833_v32 }
 0xe5d   : > { %v3835_v33 = vpop.xlane.xlu0 %3834 }
 0xe5e   : > { %v3836_v34 = vmul.f32 0.03125, %v3835_v33 }
 0xe60   : > { %v3837_v35 = vsub.f32 %v3830_v31, %v3836_v34 }
 0xe62   : > { %v3838_v36 = vmul.f32 %v3837_v35, %v3837_v35 }
 0xe64   : > { %v3839_v37 = vsel %vm898_vm1, %v3838_v36, 0.0 }
 0xe65   : > { %3840 = vadd.xlane.f32.xlu1 %v3839_v37 }
 0xef2   : > { %v3841_v38 = vpop.xlane.xlu1 %3840 }
 0xef3   : > { %v3842_v39 = vmul.f32 0.03125, %v3841_v38 }
 0xef5   : > { %v3843_v42 = vadd.f32 1e-12, %v3842_v39 }
 0xef7   : > { %4798 = vrsqrt.f32 %v3843_v42 }
 0xf01   : > { %v4799_v43 = vpop.eup %4798 }
 0xf02   : > { %v3845_v45 = vmul.f32 %v4799_v43, %v3837_v35 }
 0xf04   : > { %v3852_v47 = vmul.f32 %v4177_v44, %v3845_v45 }
 0xf06   : > { %v3859_v50 = vadd.f32 %v4178_v46, %v3852_v47 }
 0xf08   : > { %v3860_v51 = vpack.c.bf16 %v3859_v50, %v3859_v50 }
 0xf0a   : > { %3862 = vst.msk [vmem:[%s767_s1] sm:$0xf] %vm3861_vm7, %v3860_v51 }
 0xf0b   : > { %4813 = shalt.err (!%p4810_p3)
}
 0xf0c   : > { %s4814_s8 = scalar_lea.hbm %s5680_s9, 64  ;;  %s4818_s2 = scalar_lea.hbm %s5746_s24, 128 }
 0xf0d   : > { %p4815_p4 = scmp.ne.s32.totalorder %s5680_s9, %s4814_s8  ;;  %p4819_p9 = scmp.lt.u32.totalorder %s5680_s9, %s5746_s24 }
 0xf0e   : > { %p4820_p10 = scmp.lt.u32.totalorder %s4818_s2, %s4814_s8  ;;  %p4822_p12 = scmp.lt.u32.totalorder %s4814_s8, %s5680_s9 }
 0xf0f   : > { %p4816_p7 = pnand %p4815_p4, %p5030_p5 }
 0xf10   : > { %p4821_p11 = por %p4820_p10, %p4819_p9 }
 0xf11   : > { %p4817_p8 = pneg %p4816_p7 }
 0xf12   : > { %p4823_p13 = por %p4822_p12, %p4821_p11 }
 0xf14   : > { %p4824_p0 = pnand %p4823_p13, %p4817_p8 }
 0xf16   : > { %4827 = shalt.err (!%p4824_p0)
}
 0xf17   : > { %4667 = dma.vmem_to_hbm [thread:$0]  (%p5030_p5), %s5682_s7, 64, %s5680_s9, %s3864_s29  }
 0xf18 PF: > { %s5789_s25 = sld [smem:[#allocation5_spill]]  ;;  %p4673_p1 = scmp.ge.s32.totalorder %s4862_s28, 2 }
 0xf1a   : > { %p4670_p2 = pnand %p4673_p1, %p5034_p6 }
 0xf1e   : > { %s3889_s5 = sand.u32 1, %s5789_s25  }
 0xf1f   : > { %s3890_s4 = scalar_lea.sflag [#allocation3], %s3889_s5 }
 0xf20   : > { %4845 = dma.done.wait (!%p4670_p2), %s3890_s4, 64  }
 0xf21   : > { %4847 = vsyncadd (!%p4670_p2), %s3890_s4, 4294967232  ;;  %s5791_s28 = sld [smem:[#allocation7_spill]]  ;;  %s5792_s8 = sld [smem:[#allocation6_spill]] }
 0xf22   : > { %s5793_s27 = sld [smem:[#allocation8_spill]]  ;;  %s5794_s5 = smov %s4854_s26 }
 0xf27   : > { %p34_p3 = scmp.ge.s32.totalorder %s5791_s28, 4   ;;  %s5795_s26 = smov %s5792_s8 }
 0xf29   :  { %36 = sbr.rel (!%p34_p3) target bundleno = 14 (0xe), region = 166 }
 0xf30   :  { %3895 = vsyncpa [#allocation3], 1 }
 0xf31   :  { %3897 = vsyncpa [#allocation3 + $0x1], 1 }

</bundles_post_ra>
